<compile_context>
chip_gen: v6e
topology: v6e:2x2x1
jax: 0.10.0
libtpu: 0.0.40
codegen_flags: <defaults>
</compile_context>

<pallas_src>
from functools import partial

import jax
import jax.numpy as jnp
from jax.experimental import pallas as pl
from jax.experimental.pallas import tpu as pltpu


def adapter_kernel(x_ref, w1_ref, bn_ref, w2_ref, b2_ref, o_ref,
                   stats_ref, affine_ref, *maybe_h_ref,
                   batch_size, eps, stash_h):
    # x_ref:   [TB, D]        streamed batch tile
    # w1_ref:  [D, Hp]        resident
    # bn_ref:  [2, Hp]  f32   rows: gamma, beta   (b1 dropped: cancels in BN)
    # w2_ref:  [Hp, D]        resident
    # b2_ref:  [1, D]   f32
    # o_ref:   [TB, D]
    # stats_ref:  [2, Hp] f32 scratch (sum, sum_sq)
    # affine_ref: [2, Hp] f32 scratch (scale, shift)
    # maybe_h_ref: ([Bp, Hp] f32 scratch,) only when stash_h
    h_ref = maybe_h_ref[0] if stash_h else None
    p = pl.program_id(0)          # 0: statistics pass, 1: output pass
    i = pl.program_id(1)          # batch-tile index
    tb = x_ref.shape[0]
    row = pl.multiple_of(i * tb, tb)

    @pl.when(jnp.logical_and(p == 0, i == 0))
    def _init_stats():
        stats_ref[...] = jnp.zeros_like(stats_ref)

    @pl.when(p == 0)
    def _stats_pass():
        # Linear 1 on the MXU; native input dtype, f32 accumulation.
        h = jnp.dot(x_ref[...], w1_ref[...],
                    preferred_element_type=jnp.float32)
        # Batch reductions on the VPU/XLU (the MXU is already busy with x@W1).
        stats_ref[0:1, :] += jnp.sum(h, axis=0, keepdims=True)
        stats_ref[1:2, :] += jnp.sum(h * h, axis=0, keepdims=True)
        if stash_h:
            h_ref[pl.ds(row, tb), :] = h

    @pl.when(jnp.logical_and(p == 1, i == 0))
    def _finalize_stats():
        gamma = bn_ref[0:1, :]
        beta = bn_ref[1:2, :]
        inv_b = 1.0 / batch_size
        mean = stats_ref[0:1, :] * inv_b
        var = stats_ref[1:2, :] * inv_b - mean * mean      # biased variance
        inv_std = jax.lax.rsqrt(var + eps)
        scale = gamma * inv_std
        affine_ref[0:1, :] = scale
        affine_ref[1:2, :] = beta - mean * scale

    @pl.when(p == 1)
    def _output_pass():
        if stash_h:
            h = h_ref[pl.ds(row, tb), :]                   # no recompute
        else:
            h = jnp.dot(x_ref[...], w1_ref[...],
                        preferred_element_type=jnp.float32)
        # Fused BN affine (scale/shift) + ReLU.
        hn = jnp.maximum(h * affine_ref[0:1, :] + affine_ref[1:2, :], 0.0)
        out = jnp.dot(hn.astype(w2_ref.dtype), w2_ref[...],
                      preferred_element_type=jnp.float32) + b2_ref[...]
        o_ref[...] = out.astype(o_ref.dtype)


def adapter_forward(x, w1_t, b1, gamma, beta, w2_t, b2, *, block_b=None):
    """x: [B, D]; w1_t: [D, H]; b1/gamma/beta: [H]; w2_t: [H, D]; b2: [D]."""
    B, D = x.shape
    H = w1_t.shape[1]

    # b1 is intentionally unused: a bias before train-mode BatchNorm cancels
    # exactly (it shifts h and its batch mean identically).
    del b1

    # ---- lane-align the hidden dim (exact: padded features are identically
    # zero through Linear1 -> BN(gamma=0, beta=0) -> ReLU -> zero W2 rows). ----
    H_pad = ((H + 127) // 128) * 128
    if H_pad != H:
        w1_t = jnp.pad(w1_t, ((0, 0), (0, H_pad - H)))
        gamma = jnp.pad(gamma, (0, H_pad - H))
        beta = jnp.pad(beta, (0, H_pad - H))
        w2_t = jnp.pad(w2_t, ((0, H_pad - H), (0, 0)))

    # ---- batch tile: >=128 rows (fills the MXU M dim); zero-pad the batch
    # to a tile multiple.  Padded rows give h == 0 exactly (no bias), so they
    # contribute nothing to the statistics; their outputs are sliced off. ----
    if block_b is None:
        block_b = min((512, 256, 128),
                      key=lambda c: (pl.cdiv(B, c) * c, -c))
    B_pad = pl.cdiv(B, block_b) * block_b
    nb = B_pad // block_b
    x_pad = jnp.pad(x, ((0, B_pad - B), (0, 0))) if B_pad != B else x

    # Pack the per-feature BN affine params into one small resident operand.
    bn = jnp.stack([gamma, beta]).astype(jnp.float32)            # [2, Hp]
    b2_row = b2.reshape(1, D).astype(jnp.float32)                # [1, D]

    # ---- VMEM budgeting / h-stash decision ----
    isz = x.dtype.itemsize
    wsz = w1_t.dtype.itemsize
    try:
        vmem_cap = int(pltpu.get_tpu_info().vmem_capacity_bytes)
    except Exception:
        vmem_cap = 64 << 20                                      # v7x floor
    resident = 2 * D * H_pad * wsz                               # w1 + w2
    tile_io = 2 * 2 * block_b * D * isz                          # x, o (2-buf)
    small = (2 * H_pad + D) * 4 + 4 * H_pad * 4
    h_bytes = B_pad * H_pad * 4
    # Keep h resident in VMEM (skips the pass-1 x@W1 recompute and the second
    # x stream) whenever it fits; otherwise fall back to recomputing h.
    stash_h = (2 * resident + tile_io + small + h_bytes) <= int(0.7 * vmem_cap)

    needed = 2 * resident + tile_io + small + (h_bytes if stash_h else 0)
    vmem_limit = int(min(max(2 * needed, 32 << 20), int(0.92 * vmem_cap)))

    n_matmul = 2 if stash_h else 3
    flops = int(n_matmul * 2 * B_pad * D * H_pad)
    x_reads = 1 if stash_h else 2
    bytes_accessed = int((x_reads + 1) * B_pad * D * isz
                         + 2 * D * H_pad * wsz
                         + (4 * H_pad + D) * 4)

    if stash_h:
        x_index_map = lambda p, i: (i * (1 - p), 0)   # pass 1 parks on tile 0
    else:
        x_index_map = lambda p, i: (i, 0)
    out_index_map = lambda p, i: (i * p, 0)           # no writeback in pass 0

    scratch_shapes = [pltpu.VMEM((2, H_pad), jnp.float32),   # [sum; sum_sq]
                      pltpu.VMEM((2, H_pad), jnp.float32)]   # [scale; shift]
    if stash_h:
        scratch_shapes.append(pltpu.VMEM((B_pad, H_pad), jnp.float32))

    kernel = partial(adapter_kernel, batch_size=B, eps=1e-5, stash_h=stash_h)

    def build(single_buffer_weights):
        res_kwargs = {}
        if single_buffer_weights and hasattr(pl, "Buffered"):
            # Resident (constant-index) operands don't need double buffers.
            res_kwargs = dict(pipeline_mode=pl.Buffered(1))
        grid_spec = pltpu.PrefetchScalarGridSpec(
            num_scalar_prefetch=0,
            grid=(2, nb),
            in_specs=[
                pl.BlockSpec((block_b, D), x_index_map),                  # x
                pl.BlockSpec((D, H_pad), lambda p, i: (0, 0), **res_kwargs),
                pl.BlockSpec((2, H_pad), lambda p, i: (0, 0), **res_kwargs),
                pl.BlockSpec((H_pad, D), lambda p, i: (0, 0), **res_kwargs),
                pl.BlockSpec((1, D), lambda p, i: (0, 0), **res_kwargs),
            ],
            out_specs=pl.BlockSpec((block_b, D), out_index_map),
            scratch_shapes=scratch_shapes,
        )
        return pl.pallas_call(
            kernel,
            out_shape=jax.ShapeDtypeStruct((B_pad, D), x.dtype),
            grid_spec=grid_spec,
            compiler_params=pltpu.CompilerParams(
                # Stats accumulate across batch tiles and the output pass must
                # follow the stats pass, so both axes stay sequential.
                dimension_semantics=("arbitrary", "arbitrary"),
                vmem_limit_bytes=vmem_limit,
            ),
            cost_estimate=pl.CostEstimate(
                flops=flops, transcendentals=H_pad,
                bytes_accessed=bytes_accessed),
        )

    try:
        out = build(True)(x_pad, w1_t, bn, w2_t, b2_row)
    except Exception:
        # pipeline_mode / Buffered(1) unsupported in this jax version:
        # fall back to default (double-buffered) specs.
        out = build(False)(x_pad, w1_t, bn, w2_t, b2_row)

    return out[:B] if B_pad != B else out


def init_params(key, input_dim, hidden_dim):
    """Deterministic init mimicking PyTorch nn.Linear defaults (+/- 1/sqrt(fan_in))."""
    k1, k2, k3, k4 = jax.random.split(key, 4)
    bound1 = 1.0 / (input_dim ** 0.5)
    w1 = jax.random.uniform(k1, (hidden_dim, input_dim), jnp.float32, -bound1, bound1)
    b1 = jax.random.uniform(k2, (hidden_dim,), jnp.float32, -bound1, bound1)
    bound2 = 1.0 / (hidden_dim ** 0.5)
    w2 = jax.random.uniform(k3, (input_dim, hidden_dim), jnp.float32, -bound2, bound2)
    b2 = jax.random.uniform(k4, (input_dim,), jnp.float32, -bound2, bound2)
    gamma = jnp.ones((hidden_dim,), jnp.float32)   # BatchNorm1d weight init
    beta = jnp.zeros((hidden_dim,), jnp.float32)   # BatchNorm1d bias init
    # pre-transpose Linear weights to [in, out] for x @ W
    return w1.T, b1, gamma, beta, w2.T, b2


def reference_forward(x, w1_t, b1, gamma, beta, w2_t, b2):
    hi = jax.lax.Precision.HIGHEST
    h = jnp.dot(x, w1_t, precision=hi) + b1
    mean = jnp.mean(h, axis=0, keepdims=True)
    var = jnp.mean((h - mean) ** 2, axis=0, keepdims=True)
    hn = (h - mean) / jnp.sqrt(var + 1e-5) * gamma + beta
    hn = jnp.maximum(hn, 0.0)
    return jnp.dot(hn, w2_t, precision=hi) + b2


if __name__ == "__main__":
    key = jax.random.PRNGKey(0)
    # D lane-aligned; hidden deliberately sub-128 to exercise the H zero-pad
    # path; B=300 is not a multiple of the 128-row batch tile so the batch
    # padding path and the multi-tile two-pass grid (nb=3) are both exercised.
    B, input_dim, hidden_dim = 300, 128, 64

    kx, kp = jax.random.split(key)
    x = jax.random.normal(kx, (B, input_dim), jnp.float32)
    params = init_params(kp, input_dim, hidden_dim)

    out = adapter_forward(x, *params)
    out = jax.block_until_ready(out)

    ref = reference_forward(x, *params)
    assert out.shape == (B, input_dim)
    assert jnp.allclose(out, ref, atol=2e-3, rtol=2e-3), "mismatch vs JAX reference"

    print("KERNEL_OK")
</pallas_src>

<mosaic_0001>
module attributes {stable_mosaic.version = 11 : i64} {
  func.func @adapter_kernel(%arg0: i32, %arg1: i32, %arg2: memref<128x128xf32, #tpu.memory_space<vmem>>, %arg3: memref<128x128xf32, #tpu.memory_space<vmem>>, %arg4: memref<2x128xf32, #tpu.memory_space<vmem>>, %arg5: memref<128x128xf32, #tpu.memory_space<vmem>>, %arg6: memref<1x128xf32, #tpu.memory_space<vmem>>, %arg7: memref<128x128xf32, #tpu.memory_space<vmem>>, %arg8: memref<2x128xf32, #tpu.memory_space<vmem>>, %arg9: memref<2x128xf32, #tpu.memory_space<vmem>>, %arg10: memref<384x128xf32, #tpu.memory_space<vmem>>) attributes {dimension_semantics = [#tpu.dimension_semantics<arbitrary>, #tpu.dimension_semantics<arbitrary>], iteration_bounds = array<i64: 2, 3>, scalar_prefetch = 0 : i64, scratch_operands = 3 : i64, tpu.core_type = #tpu.core_type<tc>, window_params = [{transform_indices = @transform_0, window_bounds = array<i64: 128, 128>}, {pipeline_mode = #tpu.pipeline_mode<synchronous>, transform_indices = @transform_1, window_bounds = array<i64: 128, 128>}, {pipeline_mode = #tpu.pipeline_mode<synchronous>, transform_indices = @transform_2, window_bounds = array<i64: 2, 128>}, {pipeline_mode = #tpu.pipeline_mode<synchronous>, transform_indices = @transform_3, window_bounds = array<i64: 128, 128>}, {pipeline_mode = #tpu.pipeline_mode<synchronous>, transform_indices = @transform_4, window_bounds = array<i64: 1, 128>}, {transform_indices = @transform_5, window_bounds = array<i64: 128, 128>}]} {
    %c128_i32 = arith.constant 128 : i32
    %0 = arith.muli %arg1, %c128_i32 : i32
    %1 = tpu.assume_multiple %0, 128 : i32
    %c0_i32 = arith.constant 0 : i32
    %2 = arith.cmpi eq, %arg0, %c0_i32 : i32
    %c0_i32_0 = arith.constant 0 : i32
    %3 = arith.cmpi eq, %arg1, %c0_i32_0 : i32
    %4 = arith.andi %2, %3 : i1
    %5 = arith.extui %4 : i1 to i32
    %c0_i32_1 = arith.constant 0 : i32
    %6 = arith.cmpi ne, %5, %c0_i32_1 : i32
    scf.if %6 {
      %cst = arith.constant 0.000000e+00 : f32
      %18 = vector.broadcast %cst : f32 to vector<2x128xf32>
      %c0 = arith.constant 0 : index
      %c0_8 = arith.constant 0 : index
      %19 = vector.load %arg8[%c0, %c0_8] : memref<2x128xf32, #tpu.memory_space<vmem>>, vector<2x128xf32>
      tpu.vector_store %arg8[%c0, %c0_8], %18 {strides = array<i32>} : memref<2x128xf32, #tpu.memory_space<vmem>>, vector<2x128xf32>,
    } else {
    }
    %c0_i32_2 = arith.constant 0 : i32
    %7 = arith.cmpi eq, %arg0, %c0_i32_2 : i32
    %8 = arith.extui %7 : i1 to i32
    %c0_i32_3 = arith.constant 0 : i32
    %9 = arith.cmpi ne, %8, %c0_i32_3 : i32
    scf.if %9 {
      %c0 = arith.constant 0 : index
      %c0_8 = arith.constant 0 : index
      %18 = vector.load %arg2[%c0, %c0_8] : memref<128x128xf32, #tpu.memory_space<vmem>>, vector<128x128xf32>
      %c0_9 = arith.constant 0 : index
      %c0_10 = arith.constant 0 : index
      %19 = vector.load %arg3[%c0_9, %c0_10] : memref<128x128xf32, #tpu.memory_space<vmem>>, vector<128x128xf32>
      %cst = arith.constant dense<0.000000e+00> : vector<128x128xf32>
      %20 = tpu.matmul %18, %19, %cst {dimension_numbers = #tpu.dot_dimension_numbers<[1], [0], [0], [1], [0, 0, 1, 1], [], []>} : vector<128x128xf32>, vector<128x128xf32>, vector<128x128xf32> -> vector<128x128xf32>
      %c0_11 = arith.constant 0 : index
      %c0_12 = arith.constant 0 : index
      %21 = vector.load %arg8[%c0_11, %c0_12] : memref<2x128xf32, #tpu.memory_space<vmem>>, vector<1x128xf32>
      %cst_13 = arith.constant dense<0.000000e+00> : vector<128xf32>
      %22 = vector.multi_reduction <add>, %20, %cst_13 [0] : vector<128x128xf32> to vector<128xf32>
      %23 = vector.shape_cast %22 : vector<128xf32> to vector<1x128xf32>
      %24 = arith.addf %21, %23 : vector<1x128xf32>
      %c0_14 = arith.constant 0 : index
      %c0_15 = arith.constant 0 : index
      %25 = vector.load %arg8[%c0_14, %c0_15] : memref<2x128xf32, #tpu.memory_space<vmem>>, vector<1x128xf32>
      tpu.vector_store %arg8[%c0_14, %c0_15], %24 {strides = array<i32>} : memref<2x128xf32, #tpu.memory_space<vmem>>, vector<1x128xf32>,
      %c1 = arith.constant 1 : index
      %c0_16 = arith.constant 0 : index
      %26 = vector.load %arg8[%c1, %c0_16] : memref<2x128xf32, #tpu.memory_space<vmem>>, vector<1x128xf32>
      %27 = arith.mulf %20, %20 : vector<128x128xf32>
      %cst_17 = arith.constant dense<0.000000e+00> : vector<128xf32>
      %28 = vector.multi_reduction <add>, %27, %cst_17 [0] : vector<128x128xf32> to vector<128xf32>
      %29 = vector.shape_cast %28 : vector<128xf32> to vector<1x128xf32>
      %30 = arith.addf %26, %29 : vector<1x128xf32>
      %c1_18 = arith.constant 1 : index
      %c0_19 = arith.constant 0 : index
      %31 = vector.load %arg8[%c1_18, %c0_19] : memref<2x128xf32, #tpu.memory_space<vmem>>, vector<1x128xf32>
      tpu.vector_store %arg8[%c1_18, %c0_19], %30 {strides = array<i32>} : memref<2x128xf32, #tpu.memory_space<vmem>>, vector<1x128xf32>,
      %32 = arith.index_cast %1 : i32 to index
      %c0_20 = arith.constant 0 : index
      %33 = vector.load %arg10[%32, %c0_20] : memref<384x128xf32, #tpu.memory_space<vmem>>, vector<128x128xf32>
      tpu.vector_store %arg10[%32, %c0_20], %20 {strides = array<i32>} : memref<384x128xf32, #tpu.memory_space<vmem>>, vector<128x128xf32>,
    } else {
    }
    %c1_i32 = arith.constant 1 : i32
    %10 = arith.cmpi eq, %arg0, %c1_i32 : i32
    %c0_i32_4 = arith.constant 0 : i32
    %11 = arith.cmpi eq, %arg1, %c0_i32_4 : i32
    %12 = arith.andi %10, %11 : i1
    %13 = arith.extui %12 : i1 to i32
    %c0_i32_5 = arith.constant 0 : i32
    %14 = arith.cmpi ne, %13, %c0_i32_5 : i32
    scf.if %14 {
      %c0 = arith.constant 0 : index
      %c0_8 = arith.constant 0 : index
      %18 = vector.load %arg4[%c0, %c0_8] : memref<2x128xf32, #tpu.memory_space<vmem>>, vector<1x128xf32>
      %c1 = arith.constant 1 : index
      %c0_9 = arith.constant 0 : index
      %19 = vector.load %arg4[%c1, %c0_9] : memref<2x128xf32, #tpu.memory_space<vmem>>, vector<1x128xf32>
      %c0_10 = arith.constant 0 : index
      %c0_11 = arith.constant 0 : index
      %20 = vector.load %arg8[%c0_10, %c0_11] : memref<2x128xf32, #tpu.memory_space<vmem>>, vector<1x128xf32>
      %cst = arith.constant 0.00333333341 : f32
      %21 = vector.broadcast %cst : f32 to vector<1x128xf32>
      %22 = arith.mulf %20, %21 : vector<1x128xf32>
      %c1_12 = arith.constant 1 : index
      %c0_13 = arith.constant 0 : index
      %23 = vector.load %arg8[%c1_12, %c0_13] : memref<2x128xf32, #tpu.memory_space<vmem>>, vector<1x128xf32>
      %cst_14 = arith.constant 0.00333333341 : f32
      %24 = vector.broadcast %cst_14 : f32 to vector<1x128xf32>
      %25 = arith.mulf %23, %24 : vector<1x128xf32>
      %26 = arith.mulf %22, %22 : vector<1x128xf32>
      %27 = arith.subf %25, %26 : vector<1x128xf32>
      %cst_15 = arith.constant 9.99999974E-6 : f32
      %28 = vector.broadcast %cst_15 : f32 to vector<1x128xf32>
      %29 = arith.addf %27, %28 : vector<1x128xf32>
      %30 = math.rsqrt %29 : vector<1x128xf32>
      %31 = arith.mulf %18, %30 : vector<1x128xf32>
      %c0_16 = arith.constant 0 : index
      %c0_17 = arith.constant 0 : index
      %32 = vector.load %arg9[%c0_16, %c0_17] : memref<2x128xf32, #tpu.memory_space<vmem>>, vector<1x128xf32>
      tpu.vector_store %arg9[%c0_16, %c0_17], %31 {strides = array<i32>} : memref<2x128xf32, #tpu.memory_space<vmem>>, vector<1x128xf32>,
      %33 = arith.mulf %22, %31 : vector<1x128xf32>
      %34 = arith.subf %19, %33 : vector<1x128xf32>
      %c1_18 = arith.constant 1 : index
      %c0_19 = arith.constant 0 : index
      %35 = vector.load %arg9[%c1_18, %c0_19] : memref<2x128xf32, #tpu.memory_space<vmem>>, vector<1x128xf32>
      tpu.vector_store %arg9[%c1_18, %c0_19], %34 {strides = array<i32>} : memref<2x128xf32, #tpu.memory_space<vmem>>, vector<1x128xf32>,
    } else {
    }
    %c1_i32_6 = arith.constant 1 : i32
    %15 = arith.cmpi eq, %arg0, %c1_i32_6 : i32
    %16 = arith.extui %15 : i1 to i32
    %c0_i32_7 = arith.constant 0 : i32
    %17 = arith.cmpi ne, %16, %c0_i32_7 : i32
    scf.if %17 {
      %18 = arith.index_cast %1 : i32 to index
      %c0 = arith.constant 0 : index
      %19 = vector.load %arg10[%18, %c0] : memref<384x128xf32, #tpu.memory_space<vmem>>, vector<128x128xf32>
      %c0_8 = arith.constant 0 : index
      %c0_9 = arith.constant 0 : index
      %20 = vector.load %arg9[%c0_8, %c0_9] : memref<2x128xf32, #tpu.memory_space<vmem>>, vector<1x128xf32>
      %21 = vector.broadcast %20 : vector<1x128xf32> to vector<128x128xf32>
      %22 = arith.mulf %19, %21 : vector<128x128xf32>
      %c1 = arith.constant 1 : index
      %c0_10 = arith.constant 0 : index
      %23 = vector.load %arg9[%c1, %c0_10] : memref<2x128xf32, #tpu.memory_space<vmem>>, vector<1x128xf32>
      %24 = vector.broadcast %23 : vector<1x128xf32> to vector<128x128xf32>
      %25 = arith.addf %22, %24 : vector<128x128xf32>
      %cst = arith.constant 0.000000e+00 : f32
      %26 = vector.broadcast %cst : f32 to vector<128x128xf32>
      %27 = arith.maximumf %25, %26 : vector<128x128xf32>
      %c0_11 = arith.constant 0 : index
      %c0_12 = arith.constant 0 : index
      %28 = vector.load %arg5[%c0_11, %c0_12] : memref<128x128xf32, #tpu.memory_space<vmem>>, vector<128x128xf32>
      %cst_13 = arith.constant dense<0.000000e+00> : vector<128x128xf32>
      %29 = tpu.matmul %27, %28, %cst_13 {dimension_numbers = #tpu.dot_dimension_numbers<[1], [0], [0], [1], [0, 0, 1, 1], [], []>} : vector<128x128xf32>, vector<128x128xf32>, vector<128x128xf32> -> vector<128x128xf32>
      %c0_14 = arith.constant 0 : index
      %c0_15 = arith.constant 0 : index
      %30 = vector.load %arg6[%c0_14, %c0_15] : memref<1x128xf32, #tpu.memory_space<vmem>>, vector<1x128xf32>
      %31 = vector.broadcast %30 : vector<1x128xf32> to vector<128x128xf32>
      %32 = arith.addf %29, %31 : vector<128x128xf32>
      %c0_16 = arith.constant 0 : index
      %c0_17 = arith.constant 0 : index
      %33 = vector.load %arg7[%c0_16, %c0_17] : memref<128x128xf32, #tpu.memory_space<vmem>>, vector<128x128xf32>
      tpu.vector_store %arg7[%c0_16, %c0_17], %32 {strides = array<i32>} : memref<128x128xf32, #tpu.memory_space<vmem>>, vector<128x128xf32>,
    } else {
    }
    return
  }
  func.func @transform_0(%arg0: i32, %arg1: i32) -> (i32, i32) {
    %c1_i32 = arith.constant 1 : i32
    %0 = arith.subi %c1_i32, %arg0 : i32
    %1 = arith.muli %arg1, %0 : i32
    %c0_i32 = arith.constant 0 : i32
    %c0_i32_0 = arith.constant 0 : i32
    return %1, %c0_i32 : i32, i32
  }
  func.func @transform_1(%arg0: i32, %arg1: i32) -> (i32, i32) {
    %c0_i32 = arith.constant 0 : i32
    %c0_i32_0 = arith.constant 0 : i32
    %c0_i32_1 = arith.constant 0 : i32
    return %c0_i32, %c0_i32_0 : i32, i32
  }
  func.func @transform_2(%arg0: i32, %arg1: i32) -> (i32, i32) {
    %c0_i32 = arith.constant 0 : i32
    %c0_i32_0 = arith.constant 0 : i32
    %c0_i32_1 = arith.constant 0 : i32
    return %c0_i32, %c0_i32_0 : i32, i32
  }
  func.func @transform_3(%arg0: i32, %arg1: i32) -> (i32, i32) {
    %c0_i32 = arith.constant 0 : i32
    %c0_i32_0 = arith.constant 0 : i32
    %c0_i32_1 = arith.constant 0 : i32
    return %c0_i32, %c0_i32_0 : i32, i32
  }
  func.func @transform_4(%arg0: i32, %arg1: i32) -> (i32, i32) {
    %c0_i32 = arith.constant 0 : i32
    %c0_i32_0 = arith.constant 0 : i32
    %c0_i32_1 = arith.constant 0 : i32
    return %c0_i32, %c0_i32_0 : i32, i32
  }
  func.func @transform_5(%arg0: i32, %arg1: i32) -> (i32, i32) {
    %0 = arith.muli %arg1, %arg0 : i32
    %c0_i32 = arith.constant 0 : i32
    %c0_i32_0 = arith.constant 0 : i32
    return %0, %c0_i32 : i32, i32
  }
}

module attributes {stable_mosaic.version = 11 : i64} {
  func.func @adapter_kernel(%arg0: i32, %arg1: i32, %arg2: memref<128x128xf32, #tpu.memory_space<vmem>>, %arg3: memref<128x128xf32, #tpu.memory_space<vmem>>, %arg4: memref<2x128xf32, #tpu.memory_space<vmem>>, %arg5: memref<128x128xf32, #tpu.memory_space<vmem>>, %arg6: memref<1x128xf32, #tpu.memory_space<vmem>>, %arg7: memref<128x128xf32, #tpu.memory_space<vmem>>, %arg8: memref<2x128xf32, #tpu.memory_space<vmem>>, %arg9: memref<2x128xf32, #tpu.memory_space<vmem>>, %arg10: memref<384x128xf32, #tpu.memory_space<vmem>>) attributes {dimension_semantics = [#tpu.dimension_semantics<arbitrary>, #tpu.dimension_semantics<arbitrary>], iteration_bounds = array<i64: 2, 3>, scalar_prefetch = 0 : i64, scratch_operands = 3 : i64, tpu.core_type = #tpu.core_type<tc>, window_params = [{transform_indices = @transform_0, window_bounds = array<i64: 128, 128>}, {pipeline_mode = #tpu.pipeline_mode<synchronous>, transform_indices = @transform_1, window_bounds = array<i64: 128, 128>}, {pipeline_mode = #tpu.pipeline_mode<synchronous>, transform_indices = @transform_2, window_bounds = array<i64: 2, 128>}, {pipeline_mode = #tpu.pipeline_mode<synchronous>, transform_indices = @transform_3, window_bounds = array<i64: 128, 128>}, {pipeline_mode = #tpu.pipeline_mode<synchronous>, transform_indices = @transform_4, window_bounds = array<i64: 1, 128>}, {transform_indices = @transform_5, window_bounds = array<i64: 128, 128>}]} {
    %c128_i32 = arith.constant 128 : i32
    %0 = arith.muli %arg1, %c128_i32 : i32
    %1 = tpu.assume_multiple %0, 128 : i32
    %c0_i32 = arith.constant 0 : i32
    %2 = arith.cmpi eq, %arg0, %c0_i32 : i32
    %c0_i32_0 = arith.constant 0 : i32
    %3 = arith.cmpi eq, %arg1, %c0_i32_0 : i32
    %4 = arith.andi %2, %3 : i1
    %5 = arith.extui %4 : i1 to i32
    %c0_i32_1 = arith.constant 0 : i32
    %6 = arith.cmpi ne, %5, %c0_i32_1 : i32
    scf.if %6 {
      %cst = arith.constant 0.000000e+00 : f32
      %18 = vector.broadcast %cst : f32 to vector<2x128xf32>
      %c0 = arith.constant 0 : index
      %c0_8 = arith.constant 0 : index
      %19 = vector.load %arg8[%c0, %c0_8] : memref<2x128xf32, #tpu.memory_space<vmem>>, vector<2x128xf32>
      tpu.vector_store %arg8[%c0, %c0_8], %18 {strides = array<i32>} : memref<2x128xf32, #tpu.memory_space<vmem>>, vector<2x128xf32>,
    } else {
    }
    %c0_i32_2 = arith.constant 0 : i32
    %7 = arith.cmpi eq, %arg0, %c0_i32_2 : i32
    %8 = arith.extui %7 : i1 to i32
    %c0_i32_3 = arith.constant 0 : i32
    %9 = arith.cmpi ne, %8, %c0_i32_3 : i32
    scf.if %9 {
      %c0 = arith.constant 0 : index
      %c0_8 = arith.constant 0 : index
      %18 = vector.load %arg2[%c0, %c0_8] : memref<128x128xf32, #tpu.memory_space<vmem>>, vector<128x128xf32>
      %c0_9 = arith.constant 0 : index
      %c0_10 = arith.constant 0 : index
      %19 = vector.load %arg3[%c0_9, %c0_10] : memref<128x128xf32, #tpu.memory_space<vmem>>, vector<128x128xf32>
      %cst = arith.constant dense<0.000000e+00> : vector<128x128xf32>
      %20 = tpu.matmul %18, %19, %cst {dimension_numbers = #tpu.dot_dimension_numbers<[1], [0], [0], [1], [0, 0, 1, 1], [], []>} : vector<128x128xf32>, vector<128x128xf32>, vector<128x128xf32> -> vector<128x128xf32>
      %c0_11 = arith.constant 0 : index
      %c0_12 = arith.constant 0 : index
      %21 = vector.load %arg8[%c0_11, %c0_12] : memref<2x128xf32, #tpu.memory_space<vmem>>, vector<1x128xf32>
      %cst_13 = arith.constant dense<0.000000e+00> : vector<128xf32>
      %22 = vector.multi_reduction <add>, %20, %cst_13 [0] : vector<128x128xf32> to vector<128xf32>
      %23 = vector.shape_cast %22 : vector<128xf32> to vector<1x128xf32>
      %24 = arith.addf %21, %23 : vector<1x128xf32>
      %c0_14 = arith.constant 0 : index
      %c0_15 = arith.constant 0 : index
      %25 = vector.load %arg8[%c0_14, %c0_15] : memref<2x128xf32, #tpu.memory_space<vmem>>, vector<1x128xf32>
      tpu.vector_store %arg8[%c0_14, %c0_15], %24 {strides = array<i32>} : memref<2x128xf32, #tpu.memory_space<vmem>>, vector<1x128xf32>,
      %c1 = arith.constant 1 : index
      %c0_16 = arith.constant 0 : index
      %26 = vector.load %arg8[%c1, %c0_16] : memref<2x128xf32, #tpu.memory_space<vmem>>, vector<1x128xf32>
      %27 = arith.mulf %20, %20 : vector<128x128xf32>
      %cst_17 = arith.constant dense<0.000000e+00> : vector<128xf32>
      %28 = vector.multi_reduction <add>, %27, %cst_17 [0] : vector<128x128xf32> to vector<128xf32>
      %29 = vector.shape_cast %28 : vector<128xf32> to vector<1x128xf32>
      %30 = arith.addf %26, %29 : vector<1x128xf32>
      %c1_18 = arith.constant 1 : index
      %c0_19 = arith.constant 0 : index
      %31 = vector.load %arg8[%c1_18, %c0_19] : memref<2x128xf32, #tpu.memory_space<vmem>>, vector<1x128xf32>
      tpu.vector_store %arg8[%c1_18, %c0_19], %30 {strides = array<i32>} : memref<2x128xf32, #tpu.memory_space<vmem>>, vector<1x128xf32>,
      %32 = arith.index_cast %1 : i32 to index
      %c0_20 = arith.constant 0 : index
      %33 = vector.load %arg10[%32, %c0_20] : memref<384x128xf32, #tpu.memory_space<vmem>>, vector<128x128xf32>
      tpu.vector_store %arg10[%32, %c0_20], %20 {strides = array<i32>} : memref<384x128xf32, #tpu.memory_space<vmem>>, vector<128x128xf32>,
    } else {
    }
    %c1_i32 = arith.constant 1 : i32
    %10 = arith.cmpi eq, %arg0, %c1_i32 : i32
    %c0_i32_4 = arith.constant 0 : i32
    %11 = arith.cmpi eq, %arg1, %c0_i32_4 : i32
    %12 = arith.andi %10, %11 : i1
    %13 = arith.extui %12 : i1 to i32
    %c0_i32_5 = arith.constant 0 : i32
    %14 = arith.cmpi ne, %13, %c0_i32_5 : i32
    scf.if %14 {
      %c0 = arith.constant 0 : index
      %c0_8 = arith.constant 0 : index
      %18 = vector.load %arg4[%c0, %c0_8] : memref<2x128xf32, #tpu.memory_space<vmem>>, vector<1x128xf32>
      %c1 = arith.constant 1 : index
      %c0_9 = arith.constant 0 : index
      %19 = vector.load %arg4[%c1, %c0_9] : memref<2x128xf32, #tpu.memory_space<vmem>>, vector<1x128xf32>
      %c0_10 = arith.constant 0 : index
      %c0_11 = arith.constant 0 : index
      %20 = vector.load %arg8[%c0_10, %c0_11] : memref<2x128xf32, #tpu.memory_space<vmem>>, vector<1x128xf32>
      %cst = arith.constant 0.00333333341 : f32
      %21 = vector.broadcast %cst : f32 to vector<1x128xf32>
      %22 = arith.mulf %20, %21 : vector<1x128xf32>
      %c1_12 = arith.constant 1 : index
      %c0_13 = arith.constant 0 : index
      %23 = vector.load %arg8[%c1_12, %c0_13] : memref<2x128xf32, #tpu.memory_space<vmem>>, vector<1x128xf32>
      %cst_14 = arith.constant 0.00333333341 : f32
      %24 = vector.broadcast %cst_14 : f32 to vector<1x128xf32>
      %25 = arith.mulf %23, %24 : vector<1x128xf32>
      %26 = arith.mulf %22, %22 : vector<1x128xf32>
      %27 = arith.subf %25, %26 : vector<1x128xf32>
      %cst_15 = arith.constant 9.99999974E-6 : f32
      %28 = vector.broadcast %cst_15 : f32 to vector<1x128xf32>
      %29 = arith.addf %27, %28 : vector<1x128xf32>
      %30 = math.rsqrt %29 : vector<1x128xf32>
      %31 = arith.mulf %18, %30 : vector<1x128xf32>
      %c0_16 = arith.constant 0 : index
      %c0_17 = arith.constant 0 : index
      %32 = vector.load %arg9[%c0_16, %c0_17] : memref<2x128xf32, #tpu.memory_space<vmem>>, vector<1x128xf32>
      tpu.vector_store %arg9[%c0_16, %c0_17], %31 {strides = array<i32>} : memref<2x128xf32, #tpu.memory_space<vmem>>, vector<1x128xf32>,
      %33 = arith.mulf %22, %31 : vector<1x128xf32>
      %34 = arith.subf %19, %33 : vector<1x128xf32>
      %c1_18 = arith.constant 1 : index
      %c0_19 = arith.constant 0 : index
      %35 = vector.load %arg9[%c1_18, %c0_19] : memref<2x128xf32, #tpu.memory_space<vmem>>, vector<1x128xf32>
      tpu.vector_store %arg9[%c1_18, %c0_19], %34 {strides = array<i32>} : memref<2x128xf32, #tpu.memory_space<vmem>>, vector<1x128xf32>,
    } else {
    }
    %c1_i32_6 = arith.constant 1 : i32
    %15 = arith.cmpi eq, %arg0, %c1_i32_6 : i32
    %16 = arith.extui %15 : i1 to i32
    %c0_i32_7 = arith.constant 0 : i32
    %17 = arith.cmpi ne, %16, %c0_i32_7 : i32
    scf.if %17 {
      %18 = arith.index_cast %1 : i32 to index
      %c0 = arith.constant 0 : index
      %19 = vector.load %arg10[%18, %c0] : memref<384x128xf32, #tpu.memory_space<vmem>>, vector<128x128xf32>
      %c0_8 = arith.constant 0 : index
      %c0_9 = arith.constant 0 : index
      %20 = vector.load %arg9[%c0_8, %c0_9] : memref<2x128xf32, #tpu.memory_space<vmem>>, vector<1x128xf32>
      %21 = vector.broadcast %20 : vector<1x128xf32> to vector<128x128xf32>
      %22 = arith.mulf %19, %21 : vector<128x128xf32>
      %c1 = arith.constant 1 : index
      %c0_10 = arith.constant 0 : index
      %23 = vector.load %arg9[%c1, %c0_10] : memref<2x128xf32, #tpu.memory_space<vmem>>, vector<1x128xf32>
      %24 = vector.broadcast %23 : vector<1x128xf32> to vector<128x128xf32>
      %25 = arith.addf %22, %24 : vector<128x128xf32>
      %cst = arith.constant 0.000000e+00 : f32
      %26 = vector.broadcast %cst : f32 to vector<128x128xf32>
      %27 = arith.maximumf %25, %26 : vector<128x128xf32>
      %c0_11 = arith.constant 0 : index
      %c0_12 = arith.constant 0 : index
      %28 = vector.load %arg5[%c0_11, %c0_12] : memref<128x128xf32, #tpu.memory_space<vmem>>, vector<128x128xf32>
      %cst_13 = arith.constant dense<0.000000e+00> : vector<128x128xf32>
      %29 = tpu.matmul %27, %28, %cst_13 {dimension_numbers = #tpu.dot_dimension_numbers<[1], [0], [0], [1], [0, 0, 1, 1], [], []>} : vector<128x128xf32>, vector<128x128xf32>, vector<128x128xf32> -> vector<128x128xf32>
      %c0_14 = arith.constant 0 : index
      %c0_15 = arith.constant 0 : index
      %30 = vector.load %arg6[%c0_14, %c0_15] : memref<1x128xf32, #tpu.memory_space<vmem>>, vector<1x128xf32>
      %31 = vector.broadcast %30 : vector<1x128xf32> to vector<128x128xf32>
      %32 = arith.addf %29, %31 : vector<128x128xf32>
      %c0_16 = arith.constant 0 : index
      %c0_17 = arith.constant 0 : index
      %33 = vector.load %arg7[%c0_16, %c0_17] : memref<128x128xf32, #tpu.memory_space<vmem>>, vector<128x128xf32>
      tpu.vector_store %arg7[%c0_16, %c0_17], %32 {strides = array<i32>} : memref<128x128xf32, #tpu.memory_space<vmem>>, vector<128x128xf32>,
    } else {
    }
    return
  }
  func.func @transform_0(%arg0: i32, %arg1: i32) -> (i32, i32) {
    %c1_i32 = arith.constant 1 : i32
    %0 = arith.subi %c1_i32, %arg0 : i32
    %1 = arith.muli %arg1, %0 : i32
    %c0_i32 = arith.constant 0 : i32
    %c0_i32_0 = arith.constant 0 : i32
    return %1, %c0_i32 : i32, i32
  }
  func.func @transform_1(%arg0: i32, %arg1: i32) -> (i32, i32) {
    %c0_i32 = arith.constant 0 : i32
    %c0_i32_0 = arith.constant 0 : i32
    %c0_i32_1 = arith.constant 0 : i32
    return %c0_i32, %c0_i32_0 : i32, i32
  }
  func.func @transform_2(%arg0: i32, %arg1: i32) -> (i32, i32) {
    %c0_i32 = arith.constant 0 : i32
    %c0_i32_0 = arith.constant 0 : i32
    %c0_i32_1 = arith.constant 0 : i32
    return %c0_i32, %c0_i32_0 : i32, i32
  }
  func.func @transform_3(%arg0: i32, %arg1: i32) -> (i32, i32) {
    %c0_i32 = arith.constant 0 : i32
    %c0_i32_0 = arith.constant 0 : i32
    %c0_i32_1 = arith.constant 0 : i32
    return %c0_i32, %c0_i32_0 : i32, i32
  }
  func.func @transform_4(%arg0: i32, %arg1: i32) -> (i32, i32) {
    %c0_i32 = arith.constant 0 : i32
    %c0_i32_0 = arith.constant 0 : i32
    %c0_i32_1 = arith.constant 0 : i32
    return %c0_i32, %c0_i32_0 : i32, i32
  }
  func.func @transform_5(%arg0: i32, %arg1: i32) -> (i32, i32) {
    %0 = arith.muli %arg1, %arg0 : i32
    %c0_i32 = arith.constant 0 : i32
    %c0_i32_0 = arith.constant 0 : i32
    return %0, %c0_i32 : i32, i32
  }
}

</mosaic_0001>

<bundles_post_ra>
// kernel: tpu_custom_call.1
= control target key start
LH: loop header
LB: loop body
LE: loop exit
PB: predicated region body
PF: predicated region fallthrough
CT: control target
= control target key end

     0   :  { %s1997_s0 = inlined_call_operand.hbm [shape: f32[384,128], index: 0, kind: input, shape index: {}]   ;;  %s1998_s1 = inlined_call_operand.hbm [shape: f32[128,128], index: 1, kind: input, shape index: {}]   ;;  %s1999_s2 = inlined_call_operand.vmem [shape: f32[2,128], index: 2, kind: input, shape index: {}]   ;;  %s2000_s3 = inlined_call_operand.hbm [shape: f32[128,128], index: 3, kind: input, shape index: {}]   ;;  %s2001_s4 = inlined_call_operand.vmem [shape: f32[1,128], index: 4, kind: input, shape index: {}]   ;;  %s2002_s5 = inlined_call_operand.hbm [shape: f32[384,128], index: 5, kind: output, shape index: {}]  }
   0x1   :  { %2015 = sst [smem:[#allocation22_spill]] %s1998_s1 }
   0x2   :  { %2016 = sst [smem:[#allocation23_spill]] %s1999_s2 }
   0x3   :  { %2017 = sst [smem:[#allocation24_spill]] %s2000_s3 }
   0x4   :  { %2018 = sst [smem:[#allocation25_spill]] %s2001_s4 }
   0x5   :  { %2019 = sst [smem:[#allocation26_spill]] %s2002_s5 }
   0x6   :  { %10 = vsyncpa [#allocation6], 0 }
   0x7   :  { %12 = vsyncpa [#allocation6 + $0x1], 0 }
   0x8   :  { %13 = vsyncpa [#allocation9], 0 }
   0x9   :  { %14 = vsyncpa [#allocation7], 0 }
   0xa   :  { %16 = vsyncpa [#allocation7 + $0x1], 0  ;;  %s1612_s18 = smov 0   ;;  %s1614_s19 = smov 0  }
   0xb   :  { %s1616_s20 = smov 0   ;;  %s1618_s21 = smov 0  }
   0xc   :  { %s1620_s22 = smov 0   ;;  %s1622_s23 = smov 0  }
   0xd   :  { %s1624_s24 = smov 0   ;;  %s1626_s25 = smov 0  }
   0xe   :  { %s1628_s26 = smov 0   ;;  %s1630_s27 = smov 0  }
   0xf   :  { %s1632_s28 = smov 0  }
  0x10 LB: > { %2020 = sst [smem:[#allocation15_spill]] %s1531_s18  ;;  %s970_s29 = sadd.s32 4294967295, %s1571_s28   ;;  %s1571_s28 = sphi %s1632_s28, %s22_s28   ;;  %s1567_s27 = sphi %s1630_s27, %s2067_s27   ;;  %s1563_s26 = sphi %s1628_s26, %s2066_s26   ;;  %s1559_s25 = sphi %s1626_s25, %s2059_s25   ;;  %s1555_s24 = sphi %s1624_s24, %s2058_s24   ;;  %s1551_s23 = sphi %s1622_s23, %s2065_s23   ;;  %s1547_s22 = sphi %s1620_s22, %s2064_s22   ;;  %s1543_s21 = sphi %s1618_s21, %s2063_s21   ;;  %s1539_s20 = sphi %s1616_s20, %s2062_s20   ;;  %s1535_s19 = sphi %s1614_s19, %s2061_s19   ;;  %s1531_s18 = sphi %s1612_s18, %s2060_s18  }
  0x11   : > { %2021 = sst [smem:[#allocation16_spill]] %s1555_s24  ;;  %s971_s30 = sadd.s32 4294967294, %s1571_s28  }
  0x12   : > { %2022 = sst [smem:[#allocation17_spill]] %s1559_s25  ;;  %p58_p0 = scmp.ne.s32.totalorder %s1547_s22, %s1543_s21 }
  0x13   : > { %2023 = sst [smem:[#allocation18_spill]] %s1563_s26  ;;  %p1668_p1 = scmp.eq.s32.totalorder %s970_s29, 0 }
  0x14   : > { %2024 = sst [smem:[#allocation19_spill]] %s1567_s27  ;;  %p167_p2 = scmp.ne.s32.totalorder %s1539_s20, %s1535_s19 }
  0x15   : > { %p1677_p3 = por %p1668_p1, %p58_p0  ;;  %p168_p4 = scmp.eq.s32.totalorder %s970_s29, 5 }
  0x16   : > { %p173_p5 = scmp.ne.s32.totalorder %s1535_s19, %s1531_s18  ;;  %p174_p6 = scmp.eq.s32.totalorder %s971_s30, 5 }
  0x17   : > { %p1683_p7 = por %p168_p4, %p167_p2  ;;  %p972_p8 = scmp.ge.s32.totalorder %s1571_s28, 1 }
  0x18   : > { %p1688_p9 = por %p174_p6, %p173_p5  ;;  %p181_p10 = scmp.lt.s32.totalorder %s1571_s28, 7 }
  0x19   : > { %s2027_s9 = scalar_select %p1683_p7, 1, 0 }
  0x1a   : > { %s2029_s10 = scalar_select %p1688_p9, 1, 0 }
  0x1b   : > { %2028 = sst [smem:[#allocation20_spill]] %s2027_s9  ;;  %p1693_p11 = pnand %p972_p8, %p181_p10 }
  0x1c   : > { %2030 = sst [smem:[#allocation21_spill]] %s2029_s10  ;;  %s1573_s12 = smov [#allocation8]  }
  0x1d   : > { %s193_s13 = sshll.u32 %s1573_s12, 4  ;;  %p1249_p12 = pneg %p1693_p11  ;;  %s194_s13 = int_to_ptr.vmem [resolvable:$true] %s193_s13 }
  0x1e   : > { %s1574_s15 = smov [#allocation10]   ;;  %s1378_s17 = scalar_lea.vmem %s194_s13, 2048 }
  0x1f   : > { %p1701_p13 = pnand %p1249_p12, %p1668_p1  ;;  %s209_s16 = sshll.u32 %s1574_s15, 4  ;;  %s210_s16 = int_to_ptr.vmem [resolvable:$true] %s209_s16 }
  0x20   : > { %p1379_p2 = scmp.ne.s32.totalorder %s194_s13, %s1378_s17  ;;  %p1386_p6 = scmp.lt.s32.totalorder %s194_s13, %s194_s13 }
  0x21   : > { %p1369_p0 = pneg %p1701_p13  ;;  %p1387_p8 = scmp.lt.s32.totalorder %s1378_s17, %s1378_s17 }
  0x23   : > { %p1381_p4 = pnand %p1379_p2, %p1369_p0  ;;  %p1388_p10 = por %p1387_p8, %p1386_p6 }
  0x25   : > { %p1382_p5 = pneg %p1381_p4 }
  0x27   : > { %p1389_p12 = pnand %p1388_p10, %p1382_p5 }
  0x29   : > { %1392 = shalt.err (!%p1389_p12)
}
  0x2a   : > { %s2003_s21 = smov 128   ;;  %s2004_s29 = smov 8  }
  0x2b   : > { %s2033_s1 = sld [smem:[#allocation22_spill]]  ;;  %s1404_s15 = scalar_lea.vmem %s210_s16, 2048 }
  0x2c   : > { %p1405_p2 = scmp.ne.s32.totalorder %s210_s16, %s1404_s15  ;;  %p1412_p5 = scmp.lt.s32.totalorder %s210_s16, %s210_s16 }
  0x2d   : > { %p1413_p8 = scmp.lt.s32.totalorder %s1404_s15, %s1404_s15 }
  0x2e   : > { %p1407_p4 = pnand %p1405_p2, %p1369_p0 }
  0x2f   : > { %p1414_p10 = por %p1413_p8, %p1412_p5 }
  0x30   : > { %p1408_p6 = pneg %p1407_p4 }
  0x31   : > { %1252 = dma.hbm_to_vmem [thread:$0]  (!%p1701_p13), %s2033_s1, 2048, %s194_s13, [#allocation9], %s2003_s21, %s2003_s21, %s2004_s29  }
  0x32   : > { %p1415_p12 = pnand %p1414_p10, %p1408_p6 }
  0x34   : > { %1418 = shalt.err (!%p1415_p12)
}
  0x35   : > { %s2034_s3 = sld [smem:[#allocation24_spill]]  ;;  %s31_s13 = sadd.s32 1, %s1563_s26 }
  0x36   : > { %s34_s14 = sadd.s32 1, %s1567_s27  ;;  %p32_p0 = scmp.ge.s32.totalorder %s31_s13, 3 }
  0x37   : > { %s38_s30 = ssub.s32 1, %s1567_s27  ;;  %s45_s7 = sadd.s32 1, %s1551_s23 }
  0x38   : > { %s39_s12 = smul.u32 %s1563_s26, %s38_s30  ;;  %s2069_s13 = smov (%p32_p0, %s31_s13), 0 }
  0x39   : > { %s2071_s14 = smov (!%p32_p0, %s34_s14), %s1567_s27  ;;  %p52_p2 = scmp.ne.s32.totalorder %s1551_s23, %s1547_s22 }
  0x3a   : > { %p53_p4 = scmp.eq.s32.totalorder %s1571_s28, 0  ;;  %p36_p6 = scmp.ge.s32.totalorder %s2071_s14, 2 }
  0x3b   : > { %1255 = dma.hbm_to_vmem [thread:$0]  (!%p1701_p13), %s2034_s3, 2048, %s210_s16, [#allocation9], %s2003_s21, %s2003_s21, %s2004_s29  }
  0x3c   : > { %s152_s15 = smul.u32 %s1563_s26, %s1567_s27  ;;  %p1742_p13 = por %p53_p4, %p52_p2 }
  0x3d   : > { %p1266_p5 = scmp.lt.s32.totalorder %s1571_s28, 6  ;;  %s2073_s14 = smov (%p36_p6, %s2071_s14), 0 }
  0x3e   : > { %s226_s17 = sand.u32 1, %s1551_s23   ;;  %s995_s30 = sshll.u32 %s39_s12, 11 }
  0x3f   : > { %s40_s21 = ssub.s32 1, %s2073_s14  ;;  %s153_s29 = smul.u32 %s2073_s14, %s2069_s13 }
  0x40   : > { %s41_s1 = smul.u32 %s40_s21, %s2069_s13  ;;  %s976_s10 = sshll.u32 %s226_s17, 7 }
  0x41   : > { %s154_s3 = ssub.s32 %s152_s15, %s153_s29  ;;  %s2036_s27 = sadd.s32 1, %s1539_s20 }
  0x42   : > { %s42_s18 = ssub.s32 %s39_s12, %s41_s1  ;;  %p155_p8 = scmp.eq.s32.totalorder %s154_s3, 0 }
  0x43   : > { %p43_p10 = scmp.eq.s32.totalorder %s42_s18, 0  ;;  %s238_s2 = scalar_lea.hbm %s1997_s0, %s995_s30 }
  0x44   : > { %s1757_s26 = scalar_select %p155_p8, %s1539_s20, %s2036_s27  }
  0x45   : > { %s1760_s5 = scalar_select %p43_p10, %s1551_s23, %s45_s7  }
  0x46   : > { %s230_s25 = scalar_lea.vmem [#allocation5], %s976_s10  ;;  %p1769_p12 = pnand %p1266_p5, %p1742_p13 }
  0x47   : > { %s239_s24 = sshll.u32 %s230_s25, 4  ;;  %s227_s1 = scalar_lea.sflag [#allocation6], %s226_s17  ;;  %s240_s24 = int_to_ptr.vmem [resolvable:$true] %s239_s24 }
  0x48   : > { %p1421_p0 = pneg %p1769_p12  ;;  %s1432_s3 = scalar_lea.vmem %s240_s24, 2048 }
  0x49   : > { %p1433_p2 = scmp.ne.s32.totalorder %s240_s24, %s1432_s3  ;;  %s1577_s18 = smov [#allocation5]  }
  0x4a   : > { %s1437_s4 = sshll.u32 %s1577_s18, 4  ;;  %s1438_s4 = int_to_ptr.vmem [resolvable:$false] %s1437_s4 }
  0x4b   : > { %p1435_p4 = pnand %p1433_p2, %p1421_p0  ;;  %s1439_s27 = scalar_lea.vmem %s1438_s4, 4096 }
  0x4c   : > { %p1440_p8 = scmp.lt.s32.totalorder %s240_s24, %s1438_s4  ;;  %p1441_p10 = scmp.lt.s32.totalorder %s1439_s27, %s1432_s3 }
  0x4d   : > { %p1436_p6 = pneg %p1435_p4 }
  0x4e   : > { %p1442_p9 = por %p1441_p10, %p1440_p8 }
  0x50   : > { %p1443_p7 = pnand %p1442_p9, %p1436_p6 }
  0x52   : > { %1446 = shalt.err (!%p1443_p7)
}
  0x53   : > { %s2038_s25 = smov 8   ;;  %s2039_s9 = smov 128  }
  0x54   : > { %1259 = dma.hbm_to_vmem [thread:$0]  (!%p1769_p12), %s238_s2, 2048, %s240_s24, %s227_s1, %s2039_s9, %s2039_s9, %s2038_s25  }
  0x55   : > { %251 = sbr.rel (%p1693_p11) target bundleno = 732 (0x2dc), region = 40  ;;  %s253_s10 = sand.u32 (!%p1693_p11), 1, %s1547_s22  }
  0x56   : > { %s980_s29 = sshll.u32 (!%p1693_p11), %s253_s10, 7  ;;  %s254_s12 = scalar_lea.sflag (!%p1693_p11), [#allocation6], %s253_s10 }
  0x57   : > { %s1783_s7 = scalar_lea.vmem (!%p1693_p11), [#allocation5], %s980_s29 }
  0x5a   : > { %1518 = dma.done.wait (%p1677_p3), %s254_s12, 2048  }
  0x5b   : > { %1520 = vsyncadd (%p1677_p3), %s254_s12, 4294965248 }
  0x5c   : > { %1522 = dma.done.wait (%p1668_p1), [#allocation9], 4096  }
  0x5d   : > { %1524 = vsyncadd (%p1668_p1), [#allocation9], 4294963200  ;;  %s2040_s2 = sld [smem:[#allocation16_spill]]  ;;  %s289_s11 = sand.u32 1, %s1535_s19  }
  0x5e   : > { %s2041_s24 = sld [smem:[#allocation17_spill]]  ;;  %s983_s16 = sshll.u32 %s289_s11, 7 }
  0x5f   : > { %s1801_s8 = scalar_lea.vmem [#allocation11], %s983_s16 }
  0x63   : > { %s984_s15 = sshll.u32 %s2040_s2, 7  ;;  %p299_p9 = scmp.eq.s32.totalorder %s2040_s2, 0 }
  0x64   : > { %p298_p7 = scmp.eq.s32.totalorder %s2041_s24, 0 }
  0x66   : > { %p300_p3 = pnand %p299_p9, %p298_p7 }
  0x68   : > { %303 = sbr.rel (%p300_p3) target bundleno = 111 (0x6f), region = 56 }
  0x6d   : > { %v1578_v0 = vmov 0.0  }
  0x6e   : > { %304 = vst [vmem:[#allocation2] sm:$0x3] %v1578_v0 }
  0x6f PF: > { %s2042_s6 = sld [smem:[#allocation17_spill]] }
  0x75   : > { %p985_p1 = scmp.ne.s32.totalorder %s2042_s6, 0 }
  0x76   : > { %s1822_s30 = scalar_lea.vmem (!%p985_p1), [#allocation4], %s984_s15 }
  0x77   : > { %307 = sbr.rel (%p985_p1) target bundleno = 401 (0x191), region = 60 }
  0x7c   : > { %v339_v1 = vld [vmem:[#allocation8 + $0x78] sm:$0xff]  ;;  %v338_v2 = vld [vmem:[#allocation8 + $0x70] sm:$0xff]  ;;  %v337_v3 = vld [vmem:[#allocation8 + $0x68] sm:$0xff] }
  0x7d   : > { %1061 = vmatprep.subr.mxu0 %v339_v1  ;;  %1173 = vmatprep.subr.mxu1 %v339_v1  ;;  %v336_v4 = vld [vmem:[#allocation8 + $0x60] sm:$0xff]  ;;  %v335_v5 = vld [vmem:[#allocation8 + $0x58] sm:$0xff]  ;;  %v334_v6 = vld [vmem:[#allocation8 + $0x50] sm:$0xff] }
  0x7e   : > { %1062 = vmatpush3.msra.mxu0 %v339_v1  ;;  %1189 = vmatpush3.msra.mxu1 %v339_v1  ;;  %v333_v7 = vld [vmem:[#allocation8 + $0x48] sm:$0xff]  ;;  %v332_v8 = vld [vmem:[#allocation8 + $0x40] sm:$0xff]  ;;  %v331_v9 = vld [vmem:[#allocation8 + $0x38] sm:$0xff] }
  0x7f   : > { %1063 = vmatprep.subr.mxu0 %v338_v2  ;;  %1174 = vmatprep.subr.mxu1 %v338_v2  ;;  %v330_v10 = vld [vmem:[#allocation8 + $0x30] sm:$0xff]  ;;  %v308_v11 = vld [vmem:[%s1783_s7] sm:$0xff]  ;;  %v329_v12 = vld [vmem:[#allocation8 + $0x28] sm:$0xff] }
  0x80   : > { %1064 = vmatpush3.msra.mxu0 %v338_v2  ;;  %1190 = vmatpush3.msra.mxu1 %v338_v2  ;;  %v328_v13 = vld [vmem:[#allocation8 + $0x20] sm:$0xff]  ;;  %v327_v14 = vld [vmem:[#allocation8 + $0x18] sm:$0xff]  ;;  %v326_v15 = vld [vmem:[#allocation8 + $0x10] sm:$0xff] }
  0x81   : > { %1065 = vmatprep.subr.mxu0 %v337_v3  ;;  %1175 = vmatprep.subr.mxu1 %v337_v3  ;;  %v325_v16 = vld [vmem:[#allocation8 + $0x8] sm:$0xff]  ;;  %v324_v17 = vld [vmem:[#allocation8] sm:$0xff]  ;;  %v310_v19 = vld [vmem:[%s1783_s7 + $0x10] sm:$0xff] }
  0x82   : > { %1066 = vmatpush3.msra.mxu0 %v337_v3  ;;  %1191 = vmatpush3.msra.mxu1 %v337_v3  ;;  %v309_v18 = vld [vmem:[%s1783_s7 + $0x8] sm:$0xff]  ;;  %v316_v20 = vld [vmem:[%s1783_s7 + $0x40] sm:$0xff]  ;;  %v318_v22 = vld [vmem:[%s1783_s7 + $0x50] sm:$0xff] }
  0x83   : > { %1067 = vmatprep.subr.mxu0 %v336_v4  ;;  %1176 = vmatprep.subr.mxu1 %v336_v4  ;;  %v317_v21 = vld [vmem:[%s1783_s7 + $0x48] sm:$0xff]  ;;  %v311_v23 = vld [vmem:[%s1783_s7 + $0x18] sm:$0xff]  ;;  %v312_v24 = vld [vmem:[%s1783_s7 + $0x20] sm:$0xff] }
  0x84   : > { %1068 = vmatpush3.msra.mxu0 %v336_v4  ;;  %1192 = vmatpush3.msra.mxu1 %v336_v4  ;;  %v319_v25 = vld [vmem:[%s1783_s7 + $0x58] sm:$0xff]  ;;  %v320_v26 = vld [vmem:[%s1783_s7 + $0x60] sm:$0xff]  ;;  %v313_v27 = vld [vmem:[%s1783_s7 + $0x28] sm:$0xff] }
  0x85   : > { %1069 = vmatprep.subr.mxu0 %v335_v5  ;;  %1177 = vmatprep.subr.mxu1 %v335_v5  ;;  %v314_v28 = vld [vmem:[%s1783_s7 + $0x30] sm:$0xff]  ;;  %v321_v29 = vld [vmem:[%s1783_s7 + $0x68] sm:$0xff]  ;;  %v315_v31 = vld [vmem:[%s1783_s7 + $0x38] sm:$0xff] }
  0x86   : > { %1070 = vmatpush3.msra.mxu0 %v335_v5  ;;  %1193 = vmatpush3.msra.mxu1 %v335_v5  ;;  %v322_v30 = vld [vmem:[%s1783_s7 + $0x70] sm:$0xff]  ;;  %v323_v32 = vld [vmem:[%s1783_s7 + $0x78] sm:$0xff] }
  0x87   : > { %1071 = vmatprep.subr.mxu0 %v334_v6  ;;  %1178 = vmatprep.subr.mxu1 %v334_v6 }
  0x88   : > { %1072 = vmatpush3.msra.mxu0 %v334_v6  ;;  %1194 = vmatpush3.msra.mxu1 %v334_v6 }
  0x89   : > { %1073 = vmatprep.subr.mxu0 %v333_v7  ;;  %1179 = vmatprep.subr.mxu1 %v333_v7 }
  0x8a   : > { %1074 = vmatpush3.msra.mxu0 %v333_v7  ;;  %1195 = vmatpush3.msra.mxu1 %v333_v7 }
  0x8b   : > { %1075 = vmatprep.subr.mxu0 %v332_v8  ;;  %1180 = vmatprep.subr.mxu1 %v332_v8 }
  0x8c   : > { %1076 = vmatpush3.msra.mxu0 %v332_v8  ;;  %1196 = vmatpush3.msra.mxu1 %v332_v8 }
  0x8d   : > { %1077 = vmatprep.subr.mxu0 %v331_v9  ;;  %1181 = vmatprep.subr.mxu1 %v331_v9 }
  0x8e   : > { %1078 = vmatpush3.msra.mxu0 %v331_v9  ;;  %1197 = vmatpush3.msra.mxu1 %v331_v9 }
  0x8f   : > { %1079 = vmatprep.subr.mxu0 %v330_v10  ;;  %1093 = vmatprep.mubr.f32.mxu0 %v308_v11 }
  0x90   : > { %1080 = vmatpush3.msra.mxu0 %v330_v10  ;;  %1182 = vmatprep.subr.mxu1 %v330_v10 }
  0x91   : > { %1081 = vmatprep.subr.mxu0 %v329_v12  ;;  %1198 = vmatpush3.msra.mxu1 %v330_v10 }
  0x92   : > { %1082 = vmatpush3.msra.mxu0 %v329_v12  ;;  %1183 = vmatprep.subr.mxu1 %v329_v12 }
  0x93   : > { %1083 = vmatprep.subr.mxu0 %v328_v13  ;;  %1199 = vmatpush3.msra.mxu1 %v329_v12 }
  0x94   : > { %1084 = vmatpush3.msra.mxu0 %v328_v13  ;;  %1184 = vmatprep.subr.mxu1 %v328_v13 }
  0x95   : > { %1085 = vmatprep.subr.mxu0 %v327_v14  ;;  %1200 = vmatpush3.msra.mxu1 %v328_v13 }
  0x96   : > { %1086 = vmatpush3.msra.mxu0 %v327_v14  ;;  %1185 = vmatprep.subr.mxu1 %v327_v14 }
  0x97   : > { %1087 = vmatprep.subr.mxu0 %v326_v15  ;;  %1201 = vmatpush3.msra.mxu1 %v327_v14 }
  0x98   : > { %1088 = vmatpush3.msra.mxu0 %v326_v15  ;;  %1186 = vmatprep.subr.mxu1 %v326_v15 }
  0x99   : > { %1089 = vmatprep.subr.mxu0 %v325_v16  ;;  %1202 = vmatpush3.msra.mxu1 %v326_v15 }
  0x9a   : > { %1090 = vmatpush3.msra.mxu0 %v325_v16  ;;  %1187 = vmatprep.subr.mxu1 %v325_v16 }
  0x9b   : > { %1091 = vmatprep.subr.mxu0 %v324_v17  ;;  %1203 = vmatpush3.msra.mxu1 %v325_v16 }
  0x9c   : > { %1092 = vmatpush3.msra.mxu0 %v324_v17  ;;  %1188 = vmatprep.subr.mxu1 %v324_v17 }
  0x9d   : > { %1094 = vmatmul.mubr.f32.vlgmr.msra.gmra.mxu0 %v309_v18  ;;  %1204 = vmatpush3.msra.mxu1 %v324_v17 }
  0x9e   : > { %1096 = vmatprep.mubr.f32.mxu0 %v310_v19  ;;  %1105 = vmatprep.mubr.f32.mxu1 %v316_v20 }
  0x9f   : > { %1106 = vmatmul.mubr.f32.vlgmr.msra.gmra.mxu1 %v317_v21 }
  0xa0   : > { %1108 = vmatprep.mubr.f32.mxu1 %v318_v22 }
  0xa1   : > { %1097 = vmatmul.mubr.f32.gmra.mxu0 %v311_v23 }
  0xa2   : > { %1099 = vmatprep.mubr.f32.mxu0 %v312_v24 }
  0xa3   : > { %1109 = vmatmul.mubr.f32.gmra.mxu1 %v319_v25 }
  0xa4   : > { %1111 = vmatprep.mubr.f32.mxu1 %v320_v26 }
  0xa5   : > { %1100 = vmatmul.mubr.f32.gmra.mxu0 %v313_v27 }
  0xa6   : > { %1102 = vmatprep.mubr.f32.mxu0 %v314_v28 }
  0xa7   : > { %1112 = vmatmul.mubr.f32.gmra.mxu1 %v321_v29 }
  0xa8   : > { %1114 = vmatprep.mubr.f32.mxu1 %v322_v30 }
  0xa9   : > { %1103 = vmatmul.mubr.f32.gmra.mxu0 %v315_v31 }
  0xab   : > { %1115 = vmatmul.mubr.f32.gmra.mxu1 %v323_v32 }
 0x15d   : > { %v1095_v33 = vpop.f32.mrf.mxu0 }
 0x15e   : > { %551 = vst [vmem:[%s1822_s30 + $0x8] sm:$0xff] %v1095_v33  ;;  %v511_v39 = vmul.f32 %v1095_v33, %v1095_v33 }
 0x15f   : > { %v406_v34 = vpop.f32.mrf.mxu0  ;;  %v1107_v35 = vpop.f32.mrf.mxu1 }
 0x160   : > { %v510_v36 = vmul.f32 %v406_v34, %v406_v34  ;;  %550 = vst [vmem:[%s1822_s30] sm:$0xff] %v406_v34  ;;  %559 = vst [vmem:[%s1822_s30 + $0x48] sm:$0xff] %v1107_v35  ;;  %v486_v40 = vadd.f32 %v1095_v33, %v406_v34  ;;  %v519_v9 = vmul.f32 %v1107_v35, %v1107_v35 }
 0x161   : > { %v1098_v37 = vpop.f32.mrf.mxu0  ;;  %v446_v38 = vpop.f32.mrf.mxu1 }
 0x162   : > { %553 = vst [vmem:[%s1822_s30 + $0x18] sm:$0xff] %v1098_v37  ;;  %558 = vst [vmem:[%s1822_s30 + $0x40] sm:$0xff] %v446_v38  ;;  %v526_v43 = vadd.f32 %v511_v39, %v510_v36  ;;  %v513_v48 = vmul.f32 %v1098_v37, %v1098_v37  ;;  %v518_v8 = vmul.f32 %v446_v38, %v446_v38 }
 0x163   : > { %v416_v41 = vpop.f32.mrf.mxu0  ;;  %v1110_v42 = vpop.f32.mrf.mxu1 }
 0x164   : > { %v487_v44 = vadd.f32 %v486_v40, %v416_v41  ;;  %v512_v45 = vmul.f32 %v416_v41, %v416_v41  ;;  %552 = vst [vmem:[%s1822_s30 + $0x10] sm:$0xff] %v416_v41  ;;  %561 = vst [vmem:[%s1822_s30 + $0x58] sm:$0xff] %v1110_v42  ;;  %v521_v15 = vmul.f32 %v1110_v42, %v1110_v42  ;;  %v485_v40 = vld [vmem:[#allocation2] sm:$0x1] }
 0x165   : > { %v1101_v46 = vpop.f32.mrf.mxu0  ;;  %v456_v47 = vpop.f32.mrf.mxu1 }
 0x166   : > { %v527_v49 = vadd.f32 %v526_v43, %v512_v45  ;;  %555 = vst [vmem:[%s1822_s30 + $0x28] sm:$0xff] %v1101_v46  ;;  %v488_v50 = vadd.f32 %v1098_v37, %v487_v44  ;;  %560 = vst [vmem:[%s1822_s30 + $0x50] sm:$0xff] %v456_v47  ;;  %v515_v58 = vmul.f32 %v1101_v46, %v1101_v46  ;;  %v509_v43 = vld [vmem:[#allocation2 + $0x1] sm:$0x1] }
 0x167   : > { %v426_v51 = vpop.f32.mrf.mxu0  ;;  %v1113_v52 = vpop.f32.mrf.mxu1  ;;  %v520_v13 = vmul.f32 %v456_v47, %v456_v47 }
 0x168   : > { %v489_v53 = vadd.f32 %v488_v50, %v426_v51  ;;  %v514_v54 = vmul.f32 %v426_v51, %v426_v51  ;;  %v528_v55 = vadd.f32 %v527_v49, %v513_v48  ;;  %554 = vst [vmem:[%s1822_s30 + $0x20] sm:$0xff] %v426_v51  ;;  %563 = vst [vmem:[%s1822_s30 + $0x68] sm:$0xff] %v1113_v52 }
 0x169   : > { %v1104_v56 = vpop.f32.mrf.mxu0  ;;  %v466_v57 = vpop.f32.mrf.mxu1  ;;  %v523_v21 = vmul.f32 %v1113_v52, %v1113_v52 }
 0x16a   : > { %v529_v59 = vadd.f32 %v528_v55, %v514_v54  ;;  %557 = vst [vmem:[%s1822_s30 + $0x38] sm:$0xff] %v1104_v56  ;;  %v490_v60 = vadd.f32 %v1101_v46, %v489_v53  ;;  %562 = vst [vmem:[%s1822_s30 + $0x60] sm:$0xff] %v466_v57  ;;  %v517_v3 = vmul.f32 %v1104_v56, %v1104_v56 }
 0x16b   : > { %v436_v61 = vpop.f32.mrf.mxu0  ;;  %v1116_v62 = vpop.f32.mrf.mxu1  ;;  %v522_v19 = vmul.f32 %v466_v57, %v466_v57 }
 0x16c   : > { %v491_v63 = vadd.f32 %v490_v60, %v436_v61  ;;  %v516_v0 = vmul.f32 %v436_v61, %v436_v61  ;;  %v530_v1 = vadd.f32 %v529_v59, %v515_v58  ;;  %556 = vst [vmem:[%s1822_s30 + $0x30] sm:$0xff] %v436_v61  ;;  %565 = vst [vmem:[%s1822_s30 + $0x78] sm:$0xff] %v1116_v62 }
 0x16d   : > { %v476_v2 = vpop.f32.mrf.mxu1  ;;  %v525_v27 = vmul.f32 %v1116_v62, %v1116_v62 }
 0x16e   : > { %v492_v4 = vadd.f32 %v1104_v56, %v491_v63  ;;  %v531_v5 = vadd.f32 %v530_v1, %v516_v0  ;;  %564 = vst [vmem:[%s1822_s30 + $0x70] sm:$0xff] %v476_v2  ;;  %v524_v25 = vmul.f32 %v476_v2, %v476_v2 }
 0x170   : > { %v532_v6 = vadd.f32 %v531_v5, %v517_v3  ;;  %v493_v7 = vadd.f32 %v492_v4, %v446_v38 }
 0x172   : > { %v533_v10 = vadd.f32 %v532_v6, %v518_v8  ;;  %v494_v11 = vadd.f32 %v1107_v35, %v493_v7 }
 0x174   : > { %v495_v12 = vadd.f32 %v494_v11, %v456_v47  ;;  %v534_v14 = vadd.f32 %v533_v10, %v519_v9 }
 0x176   : > { %v535_v16 = vadd.f32 %v534_v14, %v520_v13  ;;  %v496_v17 = vadd.f32 %v1110_v42, %v495_v12 }
 0x178   : > { %v497_v18 = vadd.f32 %v496_v17, %v466_v57  ;;  %v536_v20 = vadd.f32 %v535_v16, %v521_v15 }
 0x17a   : > { %v537_v22 = vadd.f32 %v536_v20, %v522_v19  ;;  %v498_v23 = vadd.f32 %v1113_v52, %v497_v18 }
 0x17c   : > { %v499_v24 = vadd.f32 %v498_v23, %v476_v2  ;;  %v538_v26 = vadd.f32 %v537_v22, %v523_v21 }
 0x17e   : > { %v500_v28 = vadd.f32 %v1116_v62, %v499_v24  ;;  %v539_v29 = vadd.f32 %v538_v26, %v524_v25 }
 0x180   : > { %v501_v30 = vrot.slane %v500_v28, 4  ;;  %v540_v31 = vadd.f32 %v539_v29, %v525_v27 }
 0x182   : > { %v502_v32 = vadd.f32 %v501_v30, %v500_v28  ;;  %v541_v33 = vrot.slane %v540_v31, 4 }
 0x184   : > { %v503_v34 = vrot.slane %v502_v32, 2  ;;  %v542_v35 = vadd.f32 %v541_v33, %v540_v31 }
 0x186   : > { %v504_v36 = vadd.f32 %v503_v34, %v502_v32  ;;  %v543_v37 = vrot.slane %v542_v35, 2 }
 0x188   : > { %v505_v38 = vrot.slane %v504_v36, 1  ;;  %v544_v39 = vadd.f32 %v543_v37, %v542_v35 }
 0x18a   : > { %v506_v41 = vadd.f32 %v505_v38, %v504_v36  ;;  %v545_v42 = vrot.slane %v544_v39, 1 }
 0x18c   : > { %v507_v44 = vadd.f32 %v506_v41, %v485_v40  ;;  %v546_v45 = vadd.f32 %v545_v42, %v544_v39 }
 0x18e   : > { %508 = vst [vmem:[#allocation2] sm:$0x1] %v507_v44  ;;  %v547_v46 = vadd.f32 %v546_v45, %v509_v43 }
 0x190   : > { %548 = vst [vmem:[#allocation2 + $0x1] sm:$0x1] %v547_v46 }
 0x191 PF: > { %s2044_s21 = sld [smem:[#allocation17_spill]] }
 0x197   : > { %p566_p11 = scmp.eq.s32.totalorder %s2044_s21, 1 }
 0x199   : > { %p567_p13 = pnand %p566_p11, %p299_p9 }
 0x19a   : > { %s2046_s4 = sld [smem:[#allocation23_spill]] (!%p567_p13) }
 0x19b   : > { %570 = sbr.rel (%p567_p13) target bundleno = 446 (0x1be), region = 64 }
 0x1a0   : > { %v573_v47 = vld [vmem:[#allocation2] sm:$0x1]  ;;  %v575_v48 = vld [vmem:[#allocation2 + $0x1] sm:$0x1] }
 0x1a1   : > { %v574_v49 = vmul.f32 0.0033333334, %v573_v47  ;;  %v576_v50 = vmul.f32 0.0033333334, %v575_v48  ;;  %v571_v54 = vld [vmem:[%s2046_s4] sm:$0x1] }
 0x1a2   : > { %v572_v57 = vld [vmem:[%s2046_s4 + $0x1] sm:$0x1] }
 0x1a3   : > { %v577_v51 = vmul.f32 %v574_v49, %v574_v49 }
 0x1a5   : > { %v578_v52 = vsub.f32 %v576_v50, %v577_v51 }
 0x1a7   : > { %v579_v53 = vadd.f32 1e-05, %v578_v52 }
 0x1a9   : > { %1365 = vrsqrt.f32 %v579_v53 }
 0x1b6   : > { %v1366_v55 = vpop.eup %1365 }
 0x1b7   : > { %v581_v56 = vmul.f32 %v1366_v55, %v571_v54 }
 0x1b9   : > { %582 = vst [vmem:[#allocation3] sm:$0x1] %v581_v56  ;;  %v583_v58 = vmul.f32 %v581_v56, %v574_v49 }
 0x1bb   : > { %v584_v59 = vsub.f32 %v572_v57, %v583_v58 }
 0x1bd   : > { %585 = vst [vmem:[#allocation3 + $0x1] sm:$0x1] %v584_v59 }
 0x1be PF: > { %s2047_s9 = sld [smem:[#allocation17_spill]] }
 0x1c4   : > { %p986_p5 = scmp.ne.s32.totalorder %s2047_s9, 1 }
 0x1c5   : > { %s1852_s29 = scalar_lea.vmem (!%p986_p5), [#allocation4], %s984_s15  ;;  %s2049_s2 = sld [smem:[#allocation25_spill]] (!%p986_p5) }
 0x1c6   : > { %588 = sbr.rel (%p986_p5) target bundleno = 703 (0x2bf), region = 68 }
 0x1cb   : > { %v679_v60 = vld [vmem:[#allocation10 + $0x78] sm:$0xff]  ;;  %v678_v61 = vld [vmem:[#allocation10 + $0x70] sm:$0xff]  ;;  %v677_v62 = vld [vmem:[#allocation10 + $0x68] sm:$0xff] }
 0x1cc   : > { %1117 = vmatprep.subr.mxu0 %v679_v60  ;;  %1205 = vmatprep.subr.mxu1 %v679_v60  ;;  %v676_v63 = vld [vmem:[#allocation10 + $0x60] sm:$0xff]  ;;  %v675_v0 = vld [vmem:[#allocation10 + $0x58] sm:$0xff]  ;;  %v674_v1 = vld [vmem:[#allocation10 + $0x50] sm:$0xff] }
 0x1cd   : > { %1118 = vmatpush3.msra.mxu0 %v679_v60  ;;  %1221 = vmatpush3.msra.mxu1 %v679_v60  ;;  %v673_v2 = vld [vmem:[#allocation10 + $0x48] sm:$0xff]  ;;  %v672_v3 = vld [vmem:[#allocation10 + $0x40] sm:$0xff]  ;;  %v671_v4 = vld [vmem:[#allocation10 + $0x38] sm:$0xff] }
 0x1ce   : > { %1119 = vmatprep.subr.mxu0 %v678_v61  ;;  %1206 = vmatprep.subr.mxu1 %v678_v61  ;;  %v670_v5 = vld [vmem:[#allocation10 + $0x30] sm:$0xff]  ;;  %v590_v6 = vld [vmem:[%s1852_s29] sm:$0xff]  ;;  %v669_v9 = vld [vmem:[#allocation10 + $0x28] sm:$0xff] }
 0x1cf   : > { %1120 = vmatpush3.msra.mxu0 %v678_v61  ;;  %1222 = vmatpush3.msra.mxu1 %v678_v61  ;;  %v1855_v7 = vld [vmem:[#allocation3] ss:$0 sm:$0xff]  ;;  %v591_v10 = vld [vmem:[%s1852_s29 + $0x8] sm:$0xff]  ;;  %v592_v12 = vld [vmem:[%s1852_s29 + $0x10] sm:$0xff] }
 0x1d0   : > { %1121 = vmatprep.subr.mxu0 %v677_v62  ;;  %1207 = vmatprep.subr.mxu1 %v677_v62  ;;  %v598_v8 = vld [vmem:[%s1852_s29 + $0x40] sm:$0xff]  ;;  %v599_v11 = vld [vmem:[%s1852_s29 + $0x48] sm:$0xff]  ;;  %v611_v14 = vmul.f32 %v1855_v7, %v590_v6  ;;  %v600_v16 = vld [vmem:[%s1852_s29 + $0x50] sm:$0xff]  ;;  %v612_v18 = vmul.f32 %v1855_v7, %v591_v10  ;;  %v613_v21 = vmul.f32 %v1855_v7, %v592_v12 }
 0x1d1   : > { %1122 = vmatpush3.msra.mxu0 %v677_v62  ;;  %1223 = vmatpush3.msra.mxu1 %v677_v62  ;;  %v668_v13 = vld [vmem:[#allocation10 + $0x20] sm:$0xff]  ;;  %v619_v15 = vmul.f32 %v1855_v7, %v598_v8  ;;  %v1864_v17 = vld [vmem:[#allocation3 + $0x1] ss:$0 sm:$0xff]  ;;  %v620_v19 = vmul.f32 %v1855_v7, %v599_v11  ;;  %v593_v22 = vld [vmem:[%s1852_s29 + $0x18] sm:$0xff]  ;;  %v621_v23 = vmul.f32 %v1855_v7, %v600_v16 }
 0x1d2   : > { %1123 = vmatprep.subr.mxu0 %v676_v63  ;;  %1208 = vmatprep.subr.mxu1 %v676_v63  ;;  %v667_v20 = vld [vmem:[#allocation10 + $0x18] sm:$0xff]  ;;  %v666_v26 = vld [vmem:[#allocation10 + $0x10] sm:$0xff]  ;;  %v632_v27 = vadd.f32 %v1864_v17, %v611_v14  ;;  %v633_v30 = vadd.f32 %v1864_v17, %v612_v18  ;;  %v614_v32 = vmul.f32 %v1855_v7, %v593_v22  ;;  %v665_v33 = vld [vmem:[#allocation10 + $0x8] sm:$0xff] }
 0x1d3   : > { %1124 = vmatpush3.msra.mxu0 %v676_v63  ;;  %1224 = vmatpush3.msra.mxu1 %v676_v63  ;;  %v601_v24 = vld [vmem:[%s1852_s29 + $0x58] sm:$0xff]  ;;  %v594_v25 = vld [vmem:[%s1852_s29 + $0x20] sm:$0xff]  ;;  %v640_v28 = vadd.f32 %v1864_v17, %v619_v15  ;;  %v641_v31 = vadd.f32 %v1864_v17, %v620_v19  ;;  %v634_v34 = vadd.f32 %v1864_v17, %v613_v21  ;;  %v595_v37 = vld [vmem:[%s1852_s29 + $0x28] sm:$0xff] }
 0x1d4   : > { %1125 = vmatprep.subr.mxu0 %v675_v0  ;;  %1209 = vmatprep.subr.mxu1 %v675_v0  ;;  %v602_v29 = vld [vmem:[%s1852_s29 + $0x60] sm:$0xff]  ;;  %v622_v35 = vmul.f32 %v1855_v7, %v601_v24  ;;  %v615_v36 = vmul.f32 %v1855_v7, %v594_v25  ;;  %v642_v38 = vadd.f32 %v1864_v17, %v621_v23  ;;  %v603_v40 = vld [vmem:[%s1852_s29 + $0x68] sm:$0xff]  ;;  %v648_v42 = vmax.f32 %v632_v27, 0.0  ;;  %v596_v44 = vld [vmem:[%s1852_s29 + $0x30] sm:$0xff] }
 0x1d5   : > { %1126 = vmatpush3.msra.mxu0 %v675_v0  ;;  %1225 = vmatpush3.msra.mxu1 %v675_v0  ;;  %v623_v39 = vmul.f32 %v1855_v7, %v602_v29  ;;  %v664_v41 = vld [vmem:[#allocation10] sm:$0xff]  ;;  %v656_v43 = vmax.f32 %v640_v28, 0.0  ;;  %v604_v45 = vld [vmem:[%s1852_s29 + $0x70] sm:$0xff]  ;;  %v649_v46 = vmax.f32 %v633_v30, 0.0  ;;  %v657_v47 = vmax.f32 %v641_v31, 0.0  ;;  %v597_v58 = vld [vmem:[%s1852_s29 + $0x38] sm:$0xff] }
 0x1d6   : > { %1127 = vmatprep.subr.mxu0 %v674_v1  ;;  %1210 = vmatprep.subr.mxu1 %v674_v1  ;;  %v635_v48 = vadd.f32 %v1864_v17, %v614_v32  ;;  %v616_v49 = vmul.f32 %v1855_v7, %v595_v37  ;;  %v650_v50 = vmax.f32 %v634_v34, 0.0  ;;  %v643_v51 = vadd.f32 %v1864_v17, %v622_v35  ;;  %v605_v59 = vld [vmem:[%s1852_s29 + $0x78] sm:$0xff]  ;;  %v989_v14 = vld [vmem:[%s2049_s2] ss:$0 sm:$0xff] }
 0x1d7   : > { %1128 = vmatpush3.msra.mxu0 %v674_v1  ;;  %1226 = vmatpush3.msra.mxu1 %v674_v1  ;;  %v636_v52 = vadd.f32 %v1864_v17, %v615_v36  ;;  %v624_v53 = vmul.f32 %v1855_v7, %v603_v40  ;;  %v658_v54 = vmax.f32 %v642_v38, 0.0  ;;  %v644_v55 = vadd.f32 %v1864_v17, %v623_v39 }
 0x1d8   : > { %1129 = vmatprep.subr.mxu0 %v673_v2  ;;  %1211 = vmatprep.subr.mxu1 %v673_v2  ;;  %v617_v56 = vmul.f32 %v1855_v7, %v596_v44  ;;  %v625_v57 = vmul.f32 %v1855_v7, %v604_v45  ;;  %v651_v60 = vmax.f32 %v635_v48, 0.0  ;;  %v637_v61 = vadd.f32 %v1864_v17, %v616_v49 }
 0x1d9   : > { %1130 = vmatpush3.msra.mxu0 %v673_v2  ;;  %1227 = vmatpush3.msra.mxu1 %v673_v2  ;;  %v659_v62 = vmax.f32 %v643_v51, 0.0  ;;  %v645_v63 = vadd.f32 %v1864_v17, %v624_v53  ;;  %v618_v0 = vmul.f32 %v1855_v7, %v597_v58  ;;  %v626_v1 = vmul.f32 %v1855_v7, %v605_v59 }
 0x1da   : > { %1131 = vmatprep.subr.mxu0 %v672_v3  ;;  %1212 = vmatprep.subr.mxu1 %v672_v3  ;;  %v652_v2 = vmax.f32 %v636_v52, 0.0  ;;  %v653_v6 = vmax.f32 %v637_v61, 0.0 }
 0x1db   : > { %1132 = vmatpush3.msra.mxu0 %v672_v3  ;;  %1228 = vmatpush3.msra.mxu1 %v672_v3  ;;  %v660_v3 = vmax.f32 %v644_v55, 0.0  ;;  %v661_v8 = vmax.f32 %v645_v63, 0.0  ;;  %v647_v10 = vadd.f32 %v1864_v17, %v626_v1 }
 0x1dc   : > { %1133 = vmatprep.subr.mxu0 %v671_v4  ;;  %1213 = vmatprep.subr.mxu1 %v671_v4 }
 0x1dd   : > { %1134 = vmatpush3.msra.mxu0 %v671_v4  ;;  %1229 = vmatpush3.msra.mxu1 %v671_v4  ;;  %v638_v4 = vadd.f32 %v1864_v17, %v617_v56 }
 0x1de   : > { %1135 = vmatprep.subr.mxu0 %v670_v5  ;;  %1214 = vmatprep.subr.mxu1 %v670_v5 }
 0x1df   : > { %1136 = vmatpush3.msra.mxu0 %v670_v5  ;;  %1230 = vmatpush3.msra.mxu1 %v670_v5  ;;  %v646_v5 = vadd.f32 %v1864_v17, %v625_v57  ;;  %v654_v11 = vmax.f32 %v638_v4, 0.0 }
 0x1e0   : > { %1137 = vmatprep.subr.mxu0 %v669_v9  ;;  %1215 = vmatprep.subr.mxu1 %v669_v9 }
 0x1e1   : > { %1138 = vmatpush3.msra.mxu0 %v669_v9  ;;  %1231 = vmatpush3.msra.mxu1 %v669_v9  ;;  %v639_v9 = vadd.f32 %v1864_v17, %v618_v0  ;;  %v662_v7 = vmax.f32 %v646_v5, 0.0 }
 0x1e2   : > { %1139 = vmatprep.subr.mxu0 %v668_v13  ;;  %1216 = vmatprep.subr.mxu1 %v668_v13 }
 0x1e3   : > { %1140 = vmatpush3.msra.mxu0 %v668_v13  ;;  %1232 = vmatpush3.msra.mxu1 %v668_v13  ;;  %v655_v12 = vmax.f32 %v639_v9, 0.0  ;;  %v663_v13 = vmax.f32 %v647_v10, 0.0 }
 0x1e4   : > { %1141 = vmatprep.subr.mxu0 %v667_v20  ;;  %1217 = vmatprep.subr.mxu1 %v667_v20 }
 0x1e5   : > { %1142 = vmatpush3.msra.mxu0 %v667_v20  ;;  %1233 = vmatpush3.msra.mxu1 %v667_v20 }
 0x1e6   : > { %1143 = vmatprep.subr.mxu0 %v666_v26  ;;  %1218 = vmatprep.subr.mxu1 %v666_v26 }
 0x1e7   : > { %1144 = vmatpush3.msra.mxu0 %v666_v26  ;;  %1234 = vmatpush3.msra.mxu1 %v666_v26 }
 0x1e8   : > { %1145 = vmatprep.subr.mxu0 %v665_v33  ;;  %1219 = vmatprep.subr.mxu1 %v665_v33 }
 0x1e9   : > { %1146 = vmatpush3.msra.mxu0 %v665_v33  ;;  %1235 = vmatpush3.msra.mxu1 %v665_v33 }
 0x1ea   : > { %1147 = vmatprep.subr.mxu0 %v664_v41  ;;  %1220 = vmatprep.subr.mxu1 %v664_v41 }
 0x1eb   : > { %1148 = vmatpush3.msra.mxu0 %v664_v41  ;;  %1236 = vmatpush3.msra.mxu1 %v664_v41 }
 0x1ec   : > { %1149 = vmatprep.mubr.f32.mxu0 %v648_v42  ;;  %1161 = vmatprep.mubr.f32.mxu1 %v656_v43 }
 0x1ed   : > { %1150 = vmatmul.mubr.f32.vlgmr.msra.gmra.mxu0 %v649_v46  ;;  %1162 = vmatmul.mubr.f32.vlgmr.msra.gmra.mxu1 %v657_v47 }
 0x1ee   : > { %1152 = vmatprep.mubr.f32.mxu0 %v650_v50  ;;  %1164 = vmatprep.mubr.f32.mxu1 %v658_v54 }
 0x1f1   : > { %1153 = vmatmul.mubr.f32.gmra.mxu0 %v651_v60  ;;  %1165 = vmatmul.mubr.f32.gmra.mxu1 %v659_v62 }
 0x1f2   : > { %1155 = vmatprep.mubr.f32.mxu0 %v652_v2  ;;  %1167 = vmatprep.mubr.f32.mxu1 %v660_v3 }
 0x1f5   : > { %1156 = vmatmul.mubr.f32.gmra.mxu0 %v653_v6  ;;  %1168 = vmatmul.mubr.f32.gmra.mxu1 %v661_v8 }
 0x1f6   : > { %1158 = vmatprep.mubr.f32.mxu0 %v654_v11  ;;  %1170 = vmatprep.mubr.f32.mxu1 %v662_v7 }
 0x1f9   : > { %1159 = vmatmul.mubr.f32.gmra.mxu0 %v655_v12  ;;  %1171 = vmatmul.mubr.f32.gmra.mxu1 %v663_v13 }
 0x2ad   : > { %v1151_v15 = vpop.f32.mrf.mxu0  ;;  %v1163_v16 = vpop.f32.mrf.mxu1 }
 0x2ae   : > { %v759_v17 = vadd.f32 %v1151_v15, %v989_v14  ;;  %v799_v18 = vadd.f32 %v1163_v16, %v989_v14 }
 0x2af   : > { %v753_v19 = vpop.f32.mrf.mxu0  ;;  %v793_v20 = vpop.f32.mrf.mxu1 }
 0x2b0   : > { %833 = vst [vmem:[%s1801_s8 + $0x8] sm:$0xff] %v759_v17  ;;  %841 = vst [vmem:[%s1801_s8 + $0x48] sm:$0xff] %v799_v18  ;;  %v754_v21 = vadd.f32 %v989_v14, %v753_v19  ;;  %v794_v22 = vadd.f32 %v989_v14, %v793_v20 }
 0x2b1   : > { %v1154_v23 = vpop.f32.mrf.mxu0  ;;  %v1166_v24 = vpop.f32.mrf.mxu1 }
 0x2b2   : > { %832 = vst [vmem:[%s1801_s8] sm:$0xff] %v754_v21  ;;  %840 = vst [vmem:[%s1801_s8 + $0x40] sm:$0xff] %v794_v22  ;;  %v769_v25 = vadd.f32 %v1154_v23, %v989_v14  ;;  %v809_v26 = vadd.f32 %v1166_v24, %v989_v14 }
 0x2b3   : > { %v763_v27 = vpop.f32.mrf.mxu0  ;;  %v803_v28 = vpop.f32.mrf.mxu1 }
 0x2b4   : > { %835 = vst [vmem:[%s1801_s8 + $0x18] sm:$0xff] %v769_v25  ;;  %843 = vst [vmem:[%s1801_s8 + $0x58] sm:$0xff] %v809_v26  ;;  %v764_v29 = vadd.f32 %v989_v14, %v763_v27  ;;  %v804_v30 = vadd.f32 %v989_v14, %v803_v28 }
 0x2b5   : > { %v1157_v31 = vpop.f32.mrf.mxu0  ;;  %v1169_v32 = vpop.f32.mrf.mxu1 }
 0x2b6   : > { %834 = vst [vmem:[%s1801_s8 + $0x10] sm:$0xff] %v764_v29  ;;  %842 = vst [vmem:[%s1801_s8 + $0x50] sm:$0xff] %v804_v30  ;;  %v779_v33 = vadd.f32 %v1157_v31, %v989_v14  ;;  %v819_v34 = vadd.f32 %v1169_v32, %v989_v14 }
 0x2b7   : > { %v773_v35 = vpop.f32.mrf.mxu0  ;;  %v813_v36 = vpop.f32.mrf.mxu1 }
 0x2b8   : > { %837 = vst [vmem:[%s1801_s8 + $0x28] sm:$0xff] %v779_v33  ;;  %845 = vst [vmem:[%s1801_s8 + $0x68] sm:$0xff] %v819_v34  ;;  %v774_v37 = vadd.f32 %v989_v14, %v773_v35  ;;  %v814_v38 = vadd.f32 %v989_v14, %v813_v36 }
 0x2b9   : > { %v1160_v39 = vpop.f32.mrf.mxu0  ;;  %v1172_v40 = vpop.f32.mrf.mxu1 }
 0x2ba   : > { %836 = vst [vmem:[%s1801_s8 + $0x20] sm:$0xff] %v774_v37  ;;  %844 = vst [vmem:[%s1801_s8 + $0x60] sm:$0xff] %v814_v38  ;;  %v789_v41 = vadd.f32 %v1160_v39, %v989_v14  ;;  %v829_v42 = vadd.f32 %v1172_v40, %v989_v14 }
 0x2bb   : > { %v783_v43 = vpop.f32.mrf.mxu0  ;;  %v823_v44 = vpop.f32.mrf.mxu1 }
 0x2bc   : > { %839 = vst [vmem:[%s1801_s8 + $0x38] sm:$0xff] %v789_v41  ;;  %847 = vst [vmem:[%s1801_s8 + $0x78] sm:$0xff] %v829_v42  ;;  %v784_v45 = vadd.f32 %v989_v14, %v783_v43  ;;  %v824_v46 = vadd.f32 %v989_v14, %v823_v44 }
 0x2be   : > { %838 = vst [vmem:[%s1801_s8 + $0x30] sm:$0xff] %v784_v45  ;;  %846 = vst [vmem:[%s1801_s8 + $0x70] sm:$0xff] %v824_v46 }
 0x2bf PF: > { %s2050_s24 = sld [smem:[#allocation17_spill]]  ;;  %s863_s17 = sshll.u32 %s1801_s8, 4  ;;  %s1928_s17 = int_to_ptr.vmem [resolvable:$true] %s863_s17 }
 0x2c0   : > { %s2051_s15 = sld [smem:[#allocation16_spill]]  ;;  %s1937_s27 = scalar_lea.sflag [#allocation7], %s289_s11 }
 0x2c1   : > { %s2052_s16 = sld [smem:[#allocation20_spill]]  ;;  %s1447_s25 = scalar_lea.vmem %s1928_s17, 2048 }
 0x2c2   : > { %s2053_s3 = sld [smem:[#allocation26_spill]]  ;;  %p1448_p12 = scmp.ne.s32.totalorder %s1928_s17, %s1447_s25 }
 0x2c3   : > { %s1579_s8 = smov [#allocation11]  }
 0x2c4   : > { %s1451_s9 = sshll.u32 %s1579_s8, 4  ;;  %s1452_s9 = int_to_ptr.vmem [resolvable:$false] %s1451_s9 }
 0x2c5   : > { %s1453_s10 = scalar_lea.vmem %s1452_s9, 4096  ;;  %p1454_p6 = scmp.lt.s32.totalorder %s1928_s17, %s1452_s9 }
 0x2c6   : > { %s856_s6 = smul.u32 %s2051_s15, %s2050_s24  ;;  %p1455_p8 = scmp.lt.s32.totalorder %s1453_s10, %s1447_s25 }
 0x2c7   : > { %p2054_p0 = scmp.ne.s32.totalorder %s2052_s16, 0 }
 0x2c8   : > { %s996_s30 = sshll.u32 %s856_s6, 11  ;;  %p1456_p10 = por %p1455_p8, %p1454_p6 }
 0x2c9   : > { %s1933_s18 = scalar_lea.hbm %s2053_s3, %s996_s30  ;;  %p1449_p2 = pnand %p1448_p12, %p2054_p0 }
 0x2cb   : > { %p1450_p4 = pneg %p1449_p2 }
 0x2cd   : > { %p1457_p7 = pnand %p1456_p10, %p1450_p4 }
 0x2cf   : > { %1460 = shalt.err (!%p1457_p7)
}
 0x2d0   : > { %s1461_s11 = scalar_lea.hbm %s1933_s18, 2048  ;;  %s1465_s7 = scalar_lea.hbm %s2053_s3, 6144 }
 0x2d1   : > { %p1462_p9 = scmp.ne.s32.totalorder %s1933_s18, %s1461_s11  ;;  %p1466_p11 = scmp.lt.s32.totalorder %s1933_s18, %s2053_s3 }
 0x2d2   : > { %p1467_p13 = scmp.lt.s32.totalorder %s1465_s7, %s1461_s11 }
 0x2d3   : > { %p1463_p3 = pnand %p1462_p9, %p2054_p0 }
 0x2d4   : > { %p1468_p5 = por %p1467_p13, %p1466_p11 }
 0x2d5   : > { %p1464_p1 = pneg %p1463_p3 }
 0x2d7   : > { %p1469_p12 = pnand %p1468_p5, %p1464_p1 }
 0x2d9   : > { %1472 = shalt.err (!%p1469_p12)
}
 0x2da   : > { %s1580_s15 = smov 128   ;;  %s1581_s6 = smov 8  }
 0x2db   : > { %1247 = dma.vmem_to_hbm [thread:$0]  (%p2054_p0), %s1928_s17, 2048, %s1933_s18, %s1937_s27, %s1580_s15, %s1580_s15, %s1581_s6  }
 0x2dc PF: > { %s2055_s30 = sld [smem:[#allocation15_spill]]  ;;  %p1269_p2 = scmp.ge.s32.totalorder %s1571_s28, 2 }
 0x2dd   : > { %s2056_s21 = sld [smem:[#allocation21_spill]] }
 0x2e2   : > { %s878_s1 = sand.u32 1, %s2055_s30  }
 0x2e3   : > { %p2057_p4 = scmp.ne.s32.totalorder %s2056_s21, 0  ;;  %s879_s25 = scalar_lea.sflag [#allocation7], %s878_s1 }
 0x2e5   : > { %p1261_p6 = pnand %p1269_p2, %p2057_p4 }
 0x2e7   : > { %p1262_p8 = pneg %p1261_p6 }
 0x2e9   : > { %1526 = dma.done.wait (%p1262_p8), %s879_s25, 2048  }
 0x2ea   : > { %1528 = vsyncadd (%p1262_p8), %s879_s25, 4294965248  ;;  %s22_s28 = sadd.s32 1, %s1571_s28   ;;  %s2058_s24 = sld [smem:[#allocation18_spill]] }
 0x2eb   : > { %p19_p10 = scmp.ge.s32.totalorder %s22_s28, 8   ;;  %s2059_s25 = sld [smem:[#allocation19_spill]] }
 0x2ec   : > { %s2060_s18 = smov %s1535_s19  ;;  %s2061_s19 = smov %s1539_s20 }
 0x2ed   : > { %s2062_s20 = smov %s1757_s26  ;;  %s2063_s21 = smov %s1547_s22 }
 0x2ee   : > { %s2064_s22 = smov %s1551_s23  ;;  %s2065_s23 = smov %s1760_s5 }
 0x2ef   : > { %s2066_s26 = smov %s2069_s13  ;;  %s2067_s27 = smov %s2073_s14 }
 0x2f0   :  { %21 = sbr.rel (!%p19_p10) target bundleno = 16 (0x10), region = 111 }
 0x2f5   :  { %884 = vsyncpa [#allocation6], 1 }
 0x2f6   :  { %886 = vsyncpa [#allocation6 + $0x1], 1 }
 0x2f7   :  { %887 = vsyncpa [#allocation9], 1 }
 0x2f8   :  { %888 = vsyncpa [#allocation7], 1 }
 0x2f9   :  { %890 = vsyncpa [#allocation7 + $0x1], 1 }

// kernel: tpu_custom_call.1
= control target key start
LH: loop header
LB: loop body
LE: loop exit
PB: predicated region body
PF: predicated region fallthrough
CT: control target
= control target key end

     0   :  { %s1997_s0 = inlined_call_operand.hbm [shape: f32[384,128], index: 0, kind: input, shape index: {}]   ;;  %s1998_s1 = inlined_call_operand.hbm [shape: f32[128,128], index: 1, kind: input, shape index: {}]   ;;  %s1999_s2 = inlined_call_operand.vmem [shape: f32[2,128], index: 2, kind: input, shape index: {}]   ;;  %s2000_s3 = inlined_call_operand.hbm [shape: f32[128,128], index: 3, kind: input, shape index: {}]   ;;  %s2001_s4 = inlined_call_operand.vmem [shape: f32[1,128], index: 4, kind: input, shape index: {}]   ;;  %s2002_s5 = inlined_call_operand.hbm [shape: f32[384,128], index: 5, kind: output, shape index: {}]  }
   0x1   :  { %2015 = sst [smem:[#allocation22_spill]] %s1998_s1 }
   0x2   :  { %2016 = sst [smem:[#allocation23_spill]] %s1999_s2 }
   0x3   :  { %2017 = sst [smem:[#allocation24_spill]] %s2000_s3 }
   0x4   :  { %2018 = sst [smem:[#allocation25_spill]] %s2001_s4 }
   0x5   :  { %2019 = sst [smem:[#allocation26_spill]] %s2002_s5 }
   0x6   :  { %10 = vsyncpa [#allocation6], 0 }
   0x7   :  { %12 = vsyncpa [#allocation6 + $0x1], 0 }
   0x8   :  { %13 = vsyncpa [#allocation9], 0 }
   0x9   :  { %14 = vsyncpa [#allocation7], 0 }
   0xa   :  { %16 = vsyncpa [#allocation7 + $0x1], 0  ;;  %s1612_s18 = smov 0   ;;  %s1614_s19 = smov 0  }
   0xb   :  { %s1616_s20 = smov 0   ;;  %s1618_s21 = smov 0  }
   0xc   :  { %s1620_s22 = smov 0   ;;  %s1622_s23 = smov 0  }
   0xd   :  { %s1624_s24 = smov 0   ;;  %s1626_s25 = smov 0  }
   0xe   :  { %s1628_s26 = smov 0   ;;  %s1630_s27 = smov 0  }
   0xf   :  { %s1632_s28 = smov 0  }
  0x10 LB: > { %2020 = sst [smem:[#allocation15_spill]] %s1531_s18  ;;  %s970_s29 = sadd.s32 4294967295, %s1571_s28   ;;  %s1571_s28 = sphi %s1632_s28, %s22_s28   ;;  %s1567_s27 = sphi %s1630_s27, %s2067_s27   ;;  %s1563_s26 = sphi %s1628_s26, %s2066_s26   ;;  %s1559_s25 = sphi %s1626_s25, %s2059_s25   ;;  %s1555_s24 = sphi %s1624_s24, %s2058_s24   ;;  %s1551_s23 = sphi %s1622_s23, %s2065_s23   ;;  %s1547_s22 = sphi %s1620_s22, %s2064_s22   ;;  %s1543_s21 = sphi %s1618_s21, %s2063_s21   ;;  %s1539_s20 = sphi %s1616_s20, %s2062_s20   ;;  %s1535_s19 = sphi %s1614_s19, %s2061_s19   ;;  %s1531_s18 = sphi %s1612_s18, %s2060_s18  }
  0x11   : > { %2021 = sst [smem:[#allocation16_spill]] %s1555_s24  ;;  %s971_s30 = sadd.s32 4294967294, %s1571_s28  }
  0x12   : > { %2022 = sst [smem:[#allocation17_spill]] %s1559_s25  ;;  %p58_p0 = scmp.ne.s32.totalorder %s1547_s22, %s1543_s21 }
  0x13   : > { %2023 = sst [smem:[#allocation18_spill]] %s1563_s26  ;;  %p1668_p1 = scmp.eq.s32.totalorder %s970_s29, 0 }
  0x14   : > { %2024 = sst [smem:[#allocation19_spill]] %s1567_s27  ;;  %p167_p2 = scmp.ne.s32.totalorder %s1539_s20, %s1535_s19 }
  0x15   : > { %p1677_p3 = por %p1668_p1, %p58_p0  ;;  %p168_p4 = scmp.eq.s32.totalorder %s970_s29, 5 }
  0x16   : > { %p173_p5 = scmp.ne.s32.totalorder %s1535_s19, %s1531_s18  ;;  %p174_p6 = scmp.eq.s32.totalorder %s971_s30, 5 }
  0x17   : > { %p1683_p7 = por %p168_p4, %p167_p2  ;;  %p972_p8 = scmp.ge.s32.totalorder %s1571_s28, 1 }
  0x18   : > { %p1688_p9 = por %p174_p6, %p173_p5  ;;  %p181_p10 = scmp.lt.s32.totalorder %s1571_s28, 7 }
  0x19   : > { %s2027_s9 = scalar_select %p1683_p7, 1, 0 }
  0x1a   : > { %s2029_s10 = scalar_select %p1688_p9, 1, 0 }
  0x1b   : > { %2028 = sst [smem:[#allocation20_spill]] %s2027_s9  ;;  %p1693_p11 = pnand %p972_p8, %p181_p10 }
  0x1c   : > { %2030 = sst [smem:[#allocation21_spill]] %s2029_s10  ;;  %s1573_s12 = smov [#allocation8]  }
  0x1d   : > { %s193_s13 = sshll.u32 %s1573_s12, 4  ;;  %p1249_p12 = pneg %p1693_p11  ;;  %s194_s13 = int_to_ptr.vmem [resolvable:$true] %s193_s13 }
  0x1e   : > { %s1574_s15 = smov [#allocation10]   ;;  %s1378_s17 = scalar_lea.vmem %s194_s13, 2048 }
  0x1f   : > { %p1701_p13 = pnand %p1249_p12, %p1668_p1  ;;  %s209_s16 = sshll.u32 %s1574_s15, 4  ;;  %s210_s16 = int_to_ptr.vmem [resolvable:$true] %s209_s16 }
  0x20   : > { %p1379_p2 = scmp.ne.s32.totalorder %s194_s13, %s1378_s17  ;;  %p1386_p6 = scmp.lt.s32.totalorder %s194_s13, %s194_s13 }
  0x21   : > { %p1369_p0 = pneg %p1701_p13  ;;  %p1387_p8 = scmp.lt.s32.totalorder %s1378_s17, %s1378_s17 }
  0x23   : > { %p1381_p4 = pnand %p1379_p2, %p1369_p0  ;;  %p1388_p10 = por %p1387_p8, %p1386_p6 }
  0x25   : > { %p1382_p5 = pneg %p1381_p4 }
  0x27   : > { %p1389_p12 = pnand %p1388_p10, %p1382_p5 }
  0x29   : > { %1392 = shalt.err (!%p1389_p12)
}
  0x2a   : > { %s2003_s21 = smov 128   ;;  %s2004_s29 = smov 8  }
  0x2b   : > { %s2033_s1 = sld [smem:[#allocation22_spill]]  ;;  %s1404_s15 = scalar_lea.vmem %s210_s16, 2048 }
  0x2c   : > { %p1405_p2 = scmp.ne.s32.totalorder %s210_s16, %s1404_s15  ;;  %p1412_p5 = scmp.lt.s32.totalorder %s210_s16, %s210_s16 }
  0x2d   : > { %p1413_p8 = scmp.lt.s32.totalorder %s1404_s15, %s1404_s15 }
  0x2e   : > { %p1407_p4 = pnand %p1405_p2, %p1369_p0 }
  0x2f   : > { %p1414_p10 = por %p1413_p8, %p1412_p5 }
  0x30   : > { %p1408_p6 = pneg %p1407_p4 }
  0x31   : > { %1252 = dma.hbm_to_vmem [thread:$0]  (!%p1701_p13), %s2033_s1, 2048, %s194_s13, [#allocation9], %s2003_s21, %s2003_s21, %s2004_s29  }
  0x32   : > { %p1415_p12 = pnand %p1414_p10, %p1408_p6 }
  0x34   : > { %1418 = shalt.err (!%p1415_p12)
}
  0x35   : > { %s2034_s3 = sld [smem:[#allocation24_spill]]  ;;  %s31_s13 = sadd.s32 1, %s1563_s26 }
  0x36   : > { %s34_s14 = sadd.s32 1, %s1567_s27  ;;  %p32_p0 = scmp.ge.s32.totalorder %s31_s13, 3 }
  0x37   : > { %s38_s30 = ssub.s32 1, %s1567_s27  ;;  %s45_s7 = sadd.s32 1, %s1551_s23 }
  0x38   : > { %s39_s12 = smul.u32 %s1563_s26, %s38_s30  ;;  %s2069_s13 = smov (%p32_p0, %s31_s13), 0 }
  0x39   : > { %s2071_s14 = smov (!%p32_p0, %s34_s14), %s1567_s27  ;;  %p52_p2 = scmp.ne.s32.totalorder %s1551_s23, %s1547_s22 }
  0x3a   : > { %p53_p4 = scmp.eq.s32.totalorder %s1571_s28, 0  ;;  %p36_p6 = scmp.ge.s32.totalorder %s2071_s14, 2 }
  0x3b   : > { %1255 = dma.hbm_to_vmem [thread:$0]  (!%p1701_p13), %s2034_s3, 2048, %s210_s16, [#allocation9], %s2003_s21, %s2003_s21, %s2004_s29  }
  0x3c   : > { %s152_s15 = smul.u32 %s1563_s26, %s1567_s27  ;;  %p1742_p13 = por %p53_p4, %p52_p2 }
  0x3d   : > { %p1266_p5 = scmp.lt.s32.totalorder %s1571_s28, 6  ;;  %s2073_s14 = smov (%p36_p6, %s2071_s14), 0 }
  0x3e   : > { %s226_s17 = sand.u32 1, %s1551_s23   ;;  %s995_s30 = sshll.u32 %s39_s12, 11 }
  0x3f   : > { %s40_s21 = ssub.s32 1, %s2073_s14  ;;  %s153_s29 = smul.u32 %s2073_s14, %s2069_s13 }
  0x40   : > { %s41_s1 = smul.u32 %s40_s21, %s2069_s13  ;;  %s976_s10 = sshll.u32 %s226_s17, 7 }
  0x41   : > { %s154_s3 = ssub.s32 %s152_s15, %s153_s29  ;;  %s2036_s27 = sadd.s32 1, %s1539_s20 }
  0x42   : > { %s42_s18 = ssub.s32 %s39_s12, %s41_s1  ;;  %p155_p8 = scmp.eq.s32.totalorder %s154_s3, 0 }
  0x43   : > { %p43_p10 = scmp.eq.s32.totalorder %s42_s18, 0  ;;  %s238_s2 = scalar_lea.hbm %s1997_s0, %s995_s30 }
  0x44   : > { %s1757_s26 = scalar_select %p155_p8, %s1539_s20, %s2036_s27  }
  0x45   : > { %s1760_s5 = scalar_select %p43_p10, %s1551_s23, %s45_s7  }
  0x46   : > { %s230_s25 = scalar_lea.vmem [#allocation5], %s976_s10  ;;  %p1769_p12 = pnand %p1266_p5, %p1742_p13 }
  0x47   : > { %s239_s24 = sshll.u32 %s230_s25, 4  ;;  %s227_s1 = scalar_lea.sflag [#allocation6], %s226_s17  ;;  %s240_s24 = int_to_ptr.vmem [resolvable:$true] %s239_s24 }
  0x48   : > { %p1421_p0 = pneg %p1769_p12  ;;  %s1432_s3 = scalar_lea.vmem %s240_s24, 2048 }
  0x49   : > { %p1433_p2 = scmp.ne.s32.totalorder %s240_s24, %s1432_s3  ;;  %s1577_s18 = smov [#allocation5]  }
  0x4a   : > { %s1437_s4 = sshll.u32 %s1577_s18, 4  ;;  %s1438_s4 = int_to_ptr.vmem [resolvable:$false] %s1437_s4 }
  0x4b   : > { %p1435_p4 = pnand %p1433_p2, %p1421_p0  ;;  %s1439_s27 = scalar_lea.vmem %s1438_s4, 4096 }
  0x4c   : > { %p1440_p8 = scmp.lt.s32.totalorder %s240_s24, %s1438_s4  ;;  %p1441_p10 = scmp.lt.s32.totalorder %s1439_s27, %s1432_s3 }
  0x4d   : > { %p1436_p6 = pneg %p1435_p4 }
  0x4e   : > { %p1442_p9 = por %p1441_p10, %p1440_p8 }
  0x50   : > { %p1443_p7 = pnand %p1442_p9, %p1436_p6 }
  0x52   : > { %1446 = shalt.err (!%p1443_p7)
}
  0x53   : > { %s2038_s25 = smov 8   ;;  %s2039_s9 = smov 128  }
  0x54   : > { %1259 = dma.hbm_to_vmem [thread:$0]  (!%p1769_p12), %s238_s2, 2048, %s240_s24, %s227_s1, %s2039_s9, %s2039_s9, %s2038_s25  }
  0x55   : > { %251 = sbr.rel (%p1693_p11) target bundleno = 732 (0x2dc), region = 40  ;;  %s253_s10 = sand.u32 (!%p1693_p11), 1, %s1547_s22  }
  0x56   : > { %s980_s29 = sshll.u32 (!%p1693_p11), %s253_s10, 7  ;;  %s254_s12 = scalar_lea.sflag (!%p1693_p11), [#allocation6], %s253_s10 }
  0x57   : > { %s1783_s7 = scalar_lea.vmem (!%p1693_p11), [#allocation5], %s980_s29 }
  0x5a   : > { %1518 = dma.done.wait (%p1677_p3), %s254_s12, 2048  }
  0x5b   : > { %1520 = vsyncadd (%p1677_p3), %s254_s12, 4294965248 }
  0x5c   : > { %1522 = dma.done.wait (%p1668_p1), [#allocation9], 4096  }
  0x5d   : > { %1524 = vsyncadd (%p1668_p1), [#allocation9], 4294963200  ;;  %s2040_s2 = sld [smem:[#allocation16_spill]]  ;;  %s289_s11 = sand.u32 1, %s1535_s19  }
  0x5e   : > { %s2041_s24 = sld [smem:[#allocation17_spill]]  ;;  %s983_s16 = sshll.u32 %s289_s11, 7 }
  0x5f   : > { %s1801_s8 = scalar_lea.vmem [#allocation11], %s983_s16 }
  0x63   : > { %s984_s15 = sshll.u32 %s2040_s2, 7  ;;  %p299_p9 = scmp.eq.s32.totalorder %s2040_s2, 0 }
  0x64   : > { %p298_p7 = scmp.eq.s32.totalorder %s2041_s24, 0 }
  0x66   : > { %p300_p3 = pnand %p299_p9, %p298_p7 }
  0x68   : > { %303 = sbr.rel (%p300_p3) target bundleno = 111 (0x6f), region = 56 }
  0x6d   : > { %v1578_v0 = vmov 0.0  }
  0x6e   : > { %304 = vst [vmem:[#allocation2] sm:$0x3] %v1578_v0 }
  0x6f PF: > { %s2042_s6 = sld [smem:[#allocation17_spill]] }
  0x75   : > { %p985_p1 = scmp.ne.s32.totalorder %s2042_s6, 0 }
  0x76   : > { %s1822_s30 = scalar_lea.vmem (!%p985_p1), [#allocation4], %s984_s15 }
  0x77   : > { %307 = sbr.rel (%p985_p1) target bundleno = 401 (0x191), region = 60 }
  0x7c   : > { %v339_v1 = vld [vmem:[#allocation8 + $0x78] sm:$0xff]  ;;  %v338_v2 = vld [vmem:[#allocation8 + $0x70] sm:$0xff]  ;;  %v337_v3 = vld [vmem:[#allocation8 + $0x68] sm:$0xff] }
  0x7d   : > { %1061 = vmatprep.subr.mxu0 %v339_v1  ;;  %1173 = vmatprep.subr.mxu1 %v339_v1  ;;  %v336_v4 = vld [vmem:[#allocation8 + $0x60] sm:$0xff]  ;;  %v335_v5 = vld [vmem:[#allocation8 + $0x58] sm:$0xff]  ;;  %v334_v6 = vld [vmem:[#allocation8 + $0x50] sm:$0xff] }
  0x7e   : > { %1062 = vmatpush3.msra.mxu0 %v339_v1  ;;  %1189 = vmatpush3.msra.mxu1 %v339_v1  ;;  %v333_v7 = vld [vmem:[#allocation8 + $0x48] sm:$0xff]  ;;  %v332_v8 = vld [vmem:[#allocation8 + $0x40] sm:$0xff]  ;;  %v331_v9 = vld [vmem:[#allocation8 + $0x38] sm:$0xff] }
  0x7f   : > { %1063 = vmatprep.subr.mxu0 %v338_v2  ;;  %1174 = vmatprep.subr.mxu1 %v338_v2  ;;  %v330_v10 = vld [vmem:[#allocation8 + $0x30] sm:$0xff]  ;;  %v308_v11 = vld [vmem:[%s1783_s7] sm:$0xff]  ;;  %v329_v12 = vld [vmem:[#allocation8 + $0x28] sm:$0xff] }
  0x80   : > { %1064 = vmatpush3.msra.mxu0 %v338_v2  ;;  %1190 = vmatpush3.msra.mxu1 %v338_v2  ;;  %v328_v13 = vld [vmem:[#allocation8 + $0x20] sm:$0xff]  ;;  %v327_v14 = vld [vmem:[#allocation8 + $0x18] sm:$0xff]  ;;  %v326_v15 = vld [vmem:[#allocation8 + $0x10] sm:$0xff] }
  0x81   : > { %1065 = vmatprep.subr.mxu0 %v337_v3  ;;  %1175 = vmatprep.subr.mxu1 %v337_v3  ;;  %v325_v16 = vld [vmem:[#allocation8 + $0x8] sm:$0xff]  ;;  %v324_v17 = vld [vmem:[#allocation8] sm:$0xff]  ;;  %v310_v19 = vld [vmem:[%s1783_s7 + $0x10] sm:$0xff] }
  0x82   : > { %1066 = vmatpush3.msra.mxu0 %v337_v3  ;;  %1191 = vmatpush3.msra.mxu1 %v337_v3  ;;  %v309_v18 = vld [vmem:[%s1783_s7 + $0x8] sm:$0xff]  ;;  %v316_v20 = vld [vmem:[%s1783_s7 + $0x40] sm:$0xff]  ;;  %v318_v22 = vld [vmem:[%s1783_s7 + $0x50] sm:$0xff] }
  0x83   : > { %1067 = vmatprep.subr.mxu0 %v336_v4  ;;  %1176 = vmatprep.subr.mxu1 %v336_v4  ;;  %v317_v21 = vld [vmem:[%s1783_s7 + $0x48] sm:$0xff]  ;;  %v311_v23 = vld [vmem:[%s1783_s7 + $0x18] sm:$0xff]  ;;  %v312_v24 = vld [vmem:[%s1783_s7 + $0x20] sm:$0xff] }
  0x84   : > { %1068 = vmatpush3.msra.mxu0 %v336_v4  ;;  %1192 = vmatpush3.msra.mxu1 %v336_v4  ;;  %v319_v25 = vld [vmem:[%s1783_s7 + $0x58] sm:$0xff]  ;;  %v320_v26 = vld [vmem:[%s1783_s7 + $0x60] sm:$0xff]  ;;  %v313_v27 = vld [vmem:[%s1783_s7 + $0x28] sm:$0xff] }
  0x85   : > { %1069 = vmatprep.subr.mxu0 %v335_v5  ;;  %1177 = vmatprep.subr.mxu1 %v335_v5  ;;  %v314_v28 = vld [vmem:[%s1783_s7 + $0x30] sm:$0xff]  ;;  %v321_v29 = vld [vmem:[%s1783_s7 + $0x68] sm:$0xff]  ;;  %v315_v31 = vld [vmem:[%s1783_s7 + $0x38] sm:$0xff] }
  0x86   : > { %1070 = vmatpush3.msra.mxu0 %v335_v5  ;;  %1193 = vmatpush3.msra.mxu1 %v335_v5  ;;  %v322_v30 = vld [vmem:[%s1783_s7 + $0x70] sm:$0xff]  ;;  %v323_v32 = vld [vmem:[%s1783_s7 + $0x78] sm:$0xff] }
  0x87   : > { %1071 = vmatprep.subr.mxu0 %v334_v6  ;;  %1178 = vmatprep.subr.mxu1 %v334_v6 }
  0x88   : > { %1072 = vmatpush3.msra.mxu0 %v334_v6  ;;  %1194 = vmatpush3.msra.mxu1 %v334_v6 }
  0x89   : > { %1073 = vmatprep.subr.mxu0 %v333_v7  ;;  %1179 = vmatprep.subr.mxu1 %v333_v7 }
  0x8a   : > { %1074 = vmatpush3.msra.mxu0 %v333_v7  ;;  %1195 = vmatpush3.msra.mxu1 %v333_v7 }
  0x8b   : > { %1075 = vmatprep.subr.mxu0 %v332_v8  ;;  %1180 = vmatprep.subr.mxu1 %v332_v8 }
  0x8c   : > { %1076 = vmatpush3.msra.mxu0 %v332_v8  ;;  %1196 = vmatpush3.msra.mxu1 %v332_v8 }
  0x8d   : > { %1077 = vmatprep.subr.mxu0 %v331_v9  ;;  %1181 = vmatprep.subr.mxu1 %v331_v9 }
  0x8e   : > { %1078 = vmatpush3.msra.mxu0 %v331_v9  ;;  %1197 = vmatpush3.msra.mxu1 %v331_v9 }
  0x8f   : > { %1079 = vmatprep.subr.mxu0 %v330_v10  ;;  %1093 = vmatprep.mubr.f32.mxu0 %v308_v11 }
  0x90   : > { %1080 = vmatpush3.msra.mxu0 %v330_v10  ;;  %1182 = vmatprep.subr.mxu1 %v330_v10 }
  0x91   : > { %1081 = vmatprep.subr.mxu0 %v329_v12  ;;  %1198 = vmatpush3.msra.mxu1 %v330_v10 }
  0x92   : > { %1082 = vmatpush3.msra.mxu0 %v329_v12  ;;  %1183 = vmatprep.subr.mxu1 %v329_v12 }
  0x93   : > { %1083 = vmatprep.subr.mxu0 %v328_v13  ;;  %1199 = vmatpush3.msra.mxu1 %v329_v12 }
  0x94   : > { %1084 = vmatpush3.msra.mxu0 %v328_v13  ;;  %1184 = vmatprep.subr.mxu1 %v328_v13 }
  0x95   : > { %1085 = vmatprep.subr.mxu0 %v327_v14  ;;  %1200 = vmatpush3.msra.mxu1 %v328_v13 }
  0x96   : > { %1086 = vmatpush3.msra.mxu0 %v327_v14  ;;  %1185 = vmatprep.subr.mxu1 %v327_v14 }
  0x97   : > { %1087 = vmatprep.subr.mxu0 %v326_v15  ;;  %1201 = vmatpush3.msra.mxu1 %v327_v14 }
  0x98   : > { %1088 = vmatpush3.msra.mxu0 %v326_v15  ;;  %1186 = vmatprep.subr.mxu1 %v326_v15 }
  0x99   : > { %1089 = vmatprep.subr.mxu0 %v325_v16  ;;  %1202 = vmatpush3.msra.mxu1 %v326_v15 }
  0x9a   : > { %1090 = vmatpush3.msra.mxu0 %v325_v16  ;;  %1187 = vmatprep.subr.mxu1 %v325_v16 }
  0x9b   : > { %1091 = vmatprep.subr.mxu0 %v324_v17  ;;  %1203 = vmatpush3.msra.mxu1 %v325_v16 }
  0x9c   : > { %1092 = vmatpush3.msra.mxu0 %v324_v17  ;;  %1188 = vmatprep.subr.mxu1 %v324_v17 }
  0x9d   : > { %1094 = vmatmul.mubr.f32.vlgmr.msra.gmra.mxu0 %v309_v18  ;;  %1204 = vmatpush3.msra.mxu1 %v324_v17 }
  0x9e   : > { %1096 = vmatprep.mubr.f32.mxu0 %v310_v19  ;;  %1105 = vmatprep.mubr.f32.mxu1 %v316_v20 }
  0x9f   : > { %1106 = vmatmul.mubr.f32.vlgmr.msra.gmra.mxu1 %v317_v21 }
  0xa0   : > { %1108 = vmatprep.mubr.f32.mxu1 %v318_v22 }
  0xa1   : > { %1097 = vmatmul.mubr.f32.gmra.mxu0 %v311_v23 }
  0xa2   : > { %1099 = vmatprep.mubr.f32.mxu0 %v312_v24 }
  0xa3   : > { %1109 = vmatmul.mubr.f32.gmra.mxu1 %v319_v25 }
  0xa4   : > { %1111 = vmatprep.mubr.f32.mxu1 %v320_v26 }
  0xa5   : > { %1100 = vmatmul.mubr.f32.gmra.mxu0 %v313_v27 }
  0xa6   : > { %1102 = vmatprep.mubr.f32.mxu0 %v314_v28 }
  0xa7   : > { %1112 = vmatmul.mubr.f32.gmra.mxu1 %v321_v29 }
  0xa8   : > { %1114 = vmatprep.mubr.f32.mxu1 %v322_v30 }
  0xa9   : > { %1103 = vmatmul.mubr.f32.gmra.mxu0 %v315_v31 }
  0xab   : > { %1115 = vmatmul.mubr.f32.gmra.mxu1 %v323_v32 }
 0x15d   : > { %v1095_v33 = vpop.f32.mrf.mxu0 }
 0x15e   : > { %551 = vst [vmem:[%s1822_s30 + $0x8] sm:$0xff] %v1095_v33  ;;  %v511_v39 = vmul.f32 %v1095_v33, %v1095_v33 }
 0x15f   : > { %v406_v34 = vpop.f32.mrf.mxu0  ;;  %v1107_v35 = vpop.f32.mrf.mxu1 }
 0x160   : > { %v510_v36 = vmul.f32 %v406_v34, %v406_v34  ;;  %550 = vst [vmem:[%s1822_s30] sm:$0xff] %v406_v34  ;;  %559 = vst [vmem:[%s1822_s30 + $0x48] sm:$0xff] %v1107_v35  ;;  %v486_v40 = vadd.f32 %v1095_v33, %v406_v34  ;;  %v519_v9 = vmul.f32 %v1107_v35, %v1107_v35 }
 0x161   : > { %v1098_v37 = vpop.f32.mrf.mxu0  ;;  %v446_v38 = vpop.f32.mrf.mxu1 }
 0x162   : > { %553 = vst [vmem:[%s1822_s30 + $0x18] sm:$0xff] %v1098_v37  ;;  %558 = vst [vmem:[%s1822_s30 + $0x40] sm:$0xff] %v446_v38  ;;  %v526_v43 = vadd.f32 %v511_v39, %v510_v36  ;;  %v513_v48 = vmul.f32 %v1098_v37, %v1098_v37  ;;  %v518_v8 = vmul.f32 %v446_v38, %v446_v38 }
 0x163   : > { %v416_v41 = vpop.f32.mrf.mxu0  ;;  %v1110_v42 = vpop.f32.mrf.mxu1 }
 0x164   : > { %v487_v44 = vadd.f32 %v486_v40, %v416_v41  ;;  %v512_v45 = vmul.f32 %v416_v41, %v416_v41  ;;  %552 = vst [vmem:[%s1822_s30 + $0x10] sm:$0xff] %v416_v41  ;;  %561 = vst [vmem:[%s1822_s30 + $0x58] sm:$0xff] %v1110_v42  ;;  %v521_v15 = vmul.f32 %v1110_v42, %v1110_v42  ;;  %v485_v40 = vld [vmem:[#allocation2] sm:$0x1] }
 0x165   : > { %v1101_v46 = vpop.f32.mrf.mxu0  ;;  %v456_v47 = vpop.f32.mrf.mxu1 }
 0x166   : > { %v527_v49 = vadd.f32 %v526_v43, %v512_v45  ;;  %555 = vst [vmem:[%s1822_s30 + $0x28] sm:$0xff] %v1101_v46  ;;  %v488_v50 = vadd.f32 %v1098_v37, %v487_v44  ;;  %560 = vst [vmem:[%s1822_s30 + $0x50] sm:$0xff] %v456_v47  ;;  %v515_v58 = vmul.f32 %v1101_v46, %v1101_v46  ;;  %v509_v43 = vld [vmem:[#allocation2 + $0x1] sm:$0x1] }
 0x167   : > { %v426_v51 = vpop.f32.mrf.mxu0  ;;  %v1113_v52 = vpop.f32.mrf.mxu1  ;;  %v520_v13 = vmul.f32 %v456_v47, %v456_v47 }
 0x168   : > { %v489_v53 = vadd.f32 %v488_v50, %v426_v51  ;;  %v514_v54 = vmul.f32 %v426_v51, %v426_v51  ;;  %v528_v55 = vadd.f32 %v527_v49, %v513_v48  ;;  %554 = vst [vmem:[%s1822_s30 + $0x20] sm:$0xff] %v426_v51  ;;  %563 = vst [vmem:[%s1822_s30 + $0x68] sm:$0xff] %v1113_v52 }
 0x169   : > { %v1104_v56 = vpop.f32.mrf.mxu0  ;;  %v466_v57 = vpop.f32.mrf.mxu1  ;;  %v523_v21 = vmul.f32 %v1113_v52, %v1113_v52 }
 0x16a   : > { %v529_v59 = vadd.f32 %v528_v55, %v514_v54  ;;  %557 = vst [vmem:[%s1822_s30 + $0x38] sm:$0xff] %v1104_v56  ;;  %v490_v60 = vadd.f32 %v1101_v46, %v489_v53  ;;  %562 = vst [vmem:[%s1822_s30 + $0x60] sm:$0xff] %v466_v57  ;;  %v517_v3 = vmul.f32 %v1104_v56, %v1104_v56 }
 0x16b   : > { %v436_v61 = vpop.f32.mrf.mxu0  ;;  %v1116_v62 = vpop.f32.mrf.mxu1  ;;  %v522_v19 = vmul.f32 %v466_v57, %v466_v57 }
 0x16c   : > { %v491_v63 = vadd.f32 %v490_v60, %v436_v61  ;;  %v516_v0 = vmul.f32 %v436_v61, %v436_v61  ;;  %v530_v1 = vadd.f32 %v529_v59, %v515_v58  ;;  %556 = vst [vmem:[%s1822_s30 + $0x30] sm:$0xff] %v436_v61  ;;  %565 = vst [vmem:[%s1822_s30 + $0x78] sm:$0xff] %v1116_v62 }
 0x16d   : > { %v476_v2 = vpop.f32.mrf.mxu1  ;;  %v525_v27 = vmul.f32 %v1116_v62, %v1116_v62 }
 0x16e   : > { %v492_v4 = vadd.f32 %v1104_v56, %v491_v63  ;;  %v531_v5 = vadd.f32 %v530_v1, %v516_v0  ;;  %564 = vst [vmem:[%s1822_s30 + $0x70] sm:$0xff] %v476_v2  ;;  %v524_v25 = vmul.f32 %v476_v2, %v476_v2 }
 0x170   : > { %v532_v6 = vadd.f32 %v531_v5, %v517_v3  ;;  %v493_v7 = vadd.f32 %v492_v4, %v446_v38 }
 0x172   : > { %v533_v10 = vadd.f32 %v532_v6, %v518_v8  ;;  %v494_v11 = vadd.f32 %v1107_v35, %v493_v7 }
 0x174   : > { %v495_v12 = vadd.f32 %v494_v11, %v456_v47  ;;  %v534_v14 = vadd.f32 %v533_v10, %v519_v9 }
 0x176   : > { %v535_v16 = vadd.f32 %v534_v14, %v520_v13  ;;  %v496_v17 = vadd.f32 %v1110_v42, %v495_v12 }
 0x178   : > { %v497_v18 = vadd.f32 %v496_v17, %v466_v57  ;;  %v536_v20 = vadd.f32 %v535_v16, %v521_v15 }
 0x17a   : > { %v537_v22 = vadd.f32 %v536_v20, %v522_v19  ;;  %v498_v23 = vadd.f32 %v1113_v52, %v497_v18 }
 0x17c   : > { %v499_v24 = vadd.f32 %v498_v23, %v476_v2  ;;  %v538_v26 = vadd.f32 %v537_v22, %v523_v21 }
 0x17e   : > { %v500_v28 = vadd.f32 %v1116_v62, %v499_v24  ;;  %v539_v29 = vadd.f32 %v538_v26, %v524_v25 }
 0x180   : > { %v501_v30 = vrot.slane %v500_v28, 4  ;;  %v540_v31 = vadd.f32 %v539_v29, %v525_v27 }
 0x182   : > { %v502_v32 = vadd.f32 %v501_v30, %v500_v28  ;;  %v541_v33 = vrot.slane %v540_v31, 4 }
 0x184   : > { %v503_v34 = vrot.slane %v502_v32, 2  ;;  %v542_v35 = vadd.f32 %v541_v33, %v540_v31 }
 0x186   : > { %v504_v36 = vadd.f32 %v503_v34, %v502_v32  ;;  %v543_v37 = vrot.slane %v542_v35, 2 }
 0x188   : > { %v505_v38 = vrot.slane %v504_v36, 1  ;;  %v544_v39 = vadd.f32 %v543_v37, %v542_v35 }
 0x18a   : > { %v506_v41 = vadd.f32 %v505_v38, %v504_v36  ;;  %v545_v42 = vrot.slane %v544_v39, 1 }
 0x18c   : > { %v507_v44 = vadd.f32 %v506_v41, %v485_v40  ;;  %v546_v45 = vadd.f32 %v545_v42, %v544_v39 }
 0x18e   : > { %508 = vst [vmem:[#allocation2] sm:$0x1] %v507_v44  ;;  %v547_v46 = vadd.f32 %v546_v45, %v509_v43 }
 0x190   : > { %548 = vst [vmem:[#allocation2 + $0x1] sm:$0x1] %v547_v46 }
 0x191 PF: > { %s2044_s21 = sld [smem:[#allocation17_spill]] }
 0x197   : > { %p566_p11 = scmp.eq.s32.totalorder %s2044_s21, 1 }
 0x199   : > { %p567_p13 = pnand %p566_p11, %p299_p9 }
 0x19a   : > { %s2046_s4 = sld [smem:[#allocation23_spill]] (!%p567_p13) }
 0x19b   : > { %570 = sbr.rel (%p567_p13) target bundleno = 446 (0x1be), region = 64 }
 0x1a0   : > { %v573_v47 = vld [vmem:[#allocation2] sm:$0x1]  ;;  %v575_v48 = vld [vmem:[#allocation2 + $0x1] sm:$0x1] }
 0x1a1   : > { %v574_v49 = vmul.f32 0.0033333334, %v573_v47  ;;  %v576_v50 = vmul.f32 0.0033333334, %v575_v48  ;;  %v571_v54 = vld [vmem:[%s2046_s4] sm:$0x1] }
 0x1a2   : > { %v572_v57 = vld [vmem:[%s2046_s4 + $0x1] sm:$0x1] }
 0x1a3   : > { %v577_v51 = vmul.f32 %v574_v49, %v574_v49 }
 0x1a5   : > { %v578_v52 = vsub.f32 %v576_v50, %v577_v51 }
 0x1a7   : > { %v579_v53 = vadd.f32 1e-05, %v578_v52 }
 0x1a9   : > { %1365 = vrsqrt.f32 %v579_v53 }
 0x1b6   : > { %v1366_v55 = vpop.eup %1365 }
 0x1b7   : > { %v581_v56 = vmul.f32 %v1366_v55, %v571_v54 }
 0x1b9   : > { %582 = vst [vmem:[#allocation3] sm:$0x1] %v581_v56  ;;  %v583_v58 = vmul.f32 %v581_v56, %v574_v49 }
 0x1bb   : > { %v584_v59 = vsub.f32 %v572_v57, %v583_v58 }
 0x1bd   : > { %585 = vst [vmem:[#allocation3 + $0x1] sm:$0x1] %v584_v59 }
 0x1be PF: > { %s2047_s9 = sld [smem:[#allocation17_spill]] }
 0x1c4   : > { %p986_p5 = scmp.ne.s32.totalorder %s2047_s9, 1 }
 0x1c5   : > { %s1852_s29 = scalar_lea.vmem (!%p986_p5), [#allocation4], %s984_s15  ;;  %s2049_s2 = sld [smem:[#allocation25_spill]] (!%p986_p5) }
 0x1c6   : > { %588 = sbr.rel (%p986_p5) target bundleno = 703 (0x2bf), region = 68 }
 0x1cb   : > { %v679_v60 = vld [vmem:[#allocation10 + $0x78] sm:$0xff]  ;;  %v678_v61 = vld [vmem:[#allocation10 + $0x70] sm:$0xff]  ;;  %v677_v62 = vld [vmem:[#allocation10 + $0x68] sm:$0xff] }
 0x1cc   : > { %1117 = vmatprep.subr.mxu0 %v679_v60  ;;  %1205 = vmatprep.subr.mxu1 %v679_v60  ;;  %v676_v63 = vld [vmem:[#allocation10 + $0x60] sm:$0xff]  ;;  %v675_v0 = vld [vmem:[#allocation10 + $0x58] sm:$0xff]  ;;  %v674_v1 = vld [vmem:[#allocation10 + $0x50] sm:$0xff] }
 0x1cd   : > { %1118 = vmatpush3.msra.mxu0 %v679_v60  ;;  %1221 = vmatpush3.msra.mxu1 %v679_v60  ;;  %v673_v2 = vld [vmem:[#allocation10 + $0x48] sm:$0xff]  ;;  %v672_v3 = vld [vmem:[#allocation10 + $0x40] sm:$0xff]  ;;  %v671_v4 = vld [vmem:[#allocation10 + $0x38] sm:$0xff] }
 0x1ce   : > { %1119 = vmatprep.subr.mxu0 %v678_v61  ;;  %1206 = vmatprep.subr.mxu1 %v678_v61  ;;  %v670_v5 = vld [vmem:[#allocation10 + $0x30] sm:$0xff]  ;;  %v590_v6 = vld [vmem:[%s1852_s29] sm:$0xff]  ;;  %v669_v9 = vld [vmem:[#allocation10 + $0x28] sm:$0xff] }
 0x1cf   : > { %1120 = vmatpush3.msra.mxu0 %v678_v61  ;;  %1222 = vmatpush3.msra.mxu1 %v678_v61  ;;  %v1855_v7 = vld [vmem:[#allocation3] ss:$0 sm:$0xff]  ;;  %v591_v10 = vld [vmem:[%s1852_s29 + $0x8] sm:$0xff]  ;;  %v592_v12 = vld [vmem:[%s1852_s29 + $0x10] sm:$0xff] }
 0x1d0   : > { %1121 = vmatprep.subr.mxu0 %v677_v62  ;;  %1207 = vmatprep.subr.mxu1 %v677_v62  ;;  %v598_v8 = vld [vmem:[%s1852_s29 + $0x40] sm:$0xff]  ;;  %v599_v11 = vld [vmem:[%s1852_s29 + $0x48] sm:$0xff]  ;;  %v611_v14 = vmul.f32 %v1855_v7, %v590_v6  ;;  %v600_v16 = vld [vmem:[%s1852_s29 + $0x50] sm:$0xff]  ;;  %v612_v18 = vmul.f32 %v1855_v7, %v591_v10  ;;  %v613_v21 = vmul.f32 %v1855_v7, %v592_v12 }
 0x1d1   : > { %1122 = vmatpush3.msra.mxu0 %v677_v62  ;;  %1223 = vmatpush3.msra.mxu1 %v677_v62  ;;  %v668_v13 = vld [vmem:[#allocation10 + $0x20] sm:$0xff]  ;;  %v619_v15 = vmul.f32 %v1855_v7, %v598_v8  ;;  %v1864_v17 = vld [vmem:[#allocation3 + $0x1] ss:$0 sm:$0xff]  ;;  %v620_v19 = vmul.f32 %v1855_v7, %v599_v11  ;;  %v593_v22 = vld [vmem:[%s1852_s29 + $0x18] sm:$0xff]  ;;  %v621_v23 = vmul.f32 %v1855_v7, %v600_v16 }
 0x1d2   : > { %1123 = vmatprep.subr.mxu0 %v676_v63  ;;  %1208 = vmatprep.subr.mxu1 %v676_v63  ;;  %v667_v20 = vld [vmem:[#allocation10 + $0x18] sm:$0xff]  ;;  %v666_v26 = vld [vmem:[#allocation10 + $0x10] sm:$0xff]  ;;  %v632_v27 = vadd.f32 %v1864_v17, %v611_v14  ;;  %v633_v30 = vadd.f32 %v1864_v17, %v612_v18  ;;  %v614_v32 = vmul.f32 %v1855_v7, %v593_v22  ;;  %v665_v33 = vld [vmem:[#allocation10 + $0x8] sm:$0xff] }
 0x1d3   : > { %1124 = vmatpush3.msra.mxu0 %v676_v63  ;;  %1224 = vmatpush3.msra.mxu1 %v676_v63  ;;  %v601_v24 = vld [vmem:[%s1852_s29 + $0x58] sm:$0xff]  ;;  %v594_v25 = vld [vmem:[%s1852_s29 + $0x20] sm:$0xff]  ;;  %v640_v28 = vadd.f32 %v1864_v17, %v619_v15  ;;  %v641_v31 = vadd.f32 %v1864_v17, %v620_v19  ;;  %v634_v34 = vadd.f32 %v1864_v17, %v613_v21  ;;  %v595_v37 = vld [vmem:[%s1852_s29 + $0x28] sm:$0xff] }
 0x1d4   : > { %1125 = vmatprep.subr.mxu0 %v675_v0  ;;  %1209 = vmatprep.subr.mxu1 %v675_v0  ;;  %v602_v29 = vld [vmem:[%s1852_s29 + $0x60] sm:$0xff]  ;;  %v622_v35 = vmul.f32 %v1855_v7, %v601_v24  ;;  %v615_v36 = vmul.f32 %v1855_v7, %v594_v25  ;;  %v642_v38 = vadd.f32 %v1864_v17, %v621_v23  ;;  %v603_v40 = vld [vmem:[%s1852_s29 + $0x68] sm:$0xff]  ;;  %v648_v42 = vmax.f32 %v632_v27, 0.0  ;;  %v596_v44 = vld [vmem:[%s1852_s29 + $0x30] sm:$0xff] }
 0x1d5   : > { %1126 = vmatpush3.msra.mxu0 %v675_v0  ;;  %1225 = vmatpush3.msra.mxu1 %v675_v0  ;;  %v623_v39 = vmul.f32 %v1855_v7, %v602_v29  ;;  %v664_v41 = vld [vmem:[#allocation10] sm:$0xff]  ;;  %v656_v43 = vmax.f32 %v640_v28, 0.0  ;;  %v604_v45 = vld [vmem:[%s1852_s29 + $0x70] sm:$0xff]  ;;  %v649_v46 = vmax.f32 %v633_v30, 0.0  ;;  %v657_v47 = vmax.f32 %v641_v31, 0.0  ;;  %v597_v58 = vld [vmem:[%s1852_s29 + $0x38] sm:$0xff] }
 0x1d6   : > { %1127 = vmatprep.subr.mxu0 %v674_v1  ;;  %1210 = vmatprep.subr.mxu1 %v674_v1  ;;  %v635_v48 = vadd.f32 %v1864_v17, %v614_v32  ;;  %v616_v49 = vmul.f32 %v1855_v7, %v595_v37  ;;  %v650_v50 = vmax.f32 %v634_v34, 0.0  ;;  %v643_v51 = vadd.f32 %v1864_v17, %v622_v35  ;;  %v605_v59 = vld [vmem:[%s1852_s29 + $0x78] sm:$0xff]  ;;  %v989_v14 = vld [vmem:[%s2049_s2] ss:$0 sm:$0xff] }
 0x1d7   : > { %1128 = vmatpush3.msra.mxu0 %v674_v1  ;;  %1226 = vmatpush3.msra.mxu1 %v674_v1  ;;  %v636_v52 = vadd.f32 %v1864_v17, %v615_v36  ;;  %v624_v53 = vmul.f32 %v1855_v7, %v603_v40  ;;  %v658_v54 = vmax.f32 %v642_v38, 0.0  ;;  %v644_v55 = vadd.f32 %v1864_v17, %v623_v39 }
 0x1d8   : > { %1129 = vmatprep.subr.mxu0 %v673_v2  ;;  %1211 = vmatprep.subr.mxu1 %v673_v2  ;;  %v617_v56 = vmul.f32 %v1855_v7, %v596_v44  ;;  %v625_v57 = vmul.f32 %v1855_v7, %v604_v45  ;;  %v651_v60 = vmax.f32 %v635_v48, 0.0  ;;  %v637_v61 = vadd.f32 %v1864_v17, %v616_v49 }
 0x1d9   : > { %1130 = vmatpush3.msra.mxu0 %v673_v2  ;;  %1227 = vmatpush3.msra.mxu1 %v673_v2  ;;  %v659_v62 = vmax.f32 %v643_v51, 0.0  ;;  %v645_v63 = vadd.f32 %v1864_v17, %v624_v53  ;;  %v618_v0 = vmul.f32 %v1855_v7, %v597_v58  ;;  %v626_v1 = vmul.f32 %v1855_v7, %v605_v59 }
 0x1da   : > { %1131 = vmatprep.subr.mxu0 %v672_v3  ;;  %1212 = vmatprep.subr.mxu1 %v672_v3  ;;  %v652_v2 = vmax.f32 %v636_v52, 0.0  ;;  %v653_v6 = vmax.f32 %v637_v61, 0.0 }
 0x1db   : > { %1132 = vmatpush3.msra.mxu0 %v672_v3  ;;  %1228 = vmatpush3.msra.mxu1 %v672_v3  ;;  %v660_v3 = vmax.f32 %v644_v55, 0.0  ;;  %v661_v8 = vmax.f32 %v645_v63, 0.0  ;;  %v647_v10 = vadd.f32 %v1864_v17, %v626_v1 }
 0x1dc   : > { %1133 = vmatprep.subr.mxu0 %v671_v4  ;;  %1213 = vmatprep.subr.mxu1 %v671_v4 }
 0x1dd   : > { %1134 = vmatpush3.msra.mxu0 %v671_v4  ;;  %1229 = vmatpush3.msra.mxu1 %v671_v4  ;;  %v638_v4 = vadd.f32 %v1864_v17, %v617_v56 }
 0x1de   : > { %1135 = vmatprep.subr.mxu0 %v670_v5  ;;  %1214 = vmatprep.subr.mxu1 %v670_v5 }
 0x1df   : > { %1136 = vmatpush3.msra.mxu0 %v670_v5  ;;  %1230 = vmatpush3.msra.mxu1 %v670_v5  ;;  %v646_v5 = vadd.f32 %v1864_v17, %v625_v57  ;;  %v654_v11 = vmax.f32 %v638_v4, 0.0 }
 0x1e0   : > { %1137 = vmatprep.subr.mxu0 %v669_v9  ;;  %1215 = vmatprep.subr.mxu1 %v669_v9 }
 0x1e1   : > { %1138 = vmatpush3.msra.mxu0 %v669_v9  ;;  %1231 = vmatpush3.msra.mxu1 %v669_v9  ;;  %v639_v9 = vadd.f32 %v1864_v17, %v618_v0  ;;  %v662_v7 = vmax.f32 %v646_v5, 0.0 }
 0x1e2   : > { %1139 = vmatprep.subr.mxu0 %v668_v13  ;;  %1216 = vmatprep.subr.mxu1 %v668_v13 }
 0x1e3   : > { %1140 = vmatpush3.msra.mxu0 %v668_v13  ;;  %1232 = vmatpush3.msra.mxu1 %v668_v13  ;;  %v655_v12 = vmax.f32 %v639_v9, 0.0  ;;  %v663_v13 = vmax.f32 %v647_v10, 0.0 }
 0x1e4   : > { %1141 = vmatprep.subr.mxu0 %v667_v20  ;;  %1217 = vmatprep.subr.mxu1 %v667_v20 }
 0x1e5   : > { %1142 = vmatpush3.msra.mxu0 %v667_v20  ;;  %1233 = vmatpush3.msra.mxu1 %v667_v20 }
 0x1e6   : > { %1143 = vmatprep.subr.mxu0 %v666_v26  ;;  %1218 = vmatprep.subr.mxu1 %v666_v26 }
 0x1e7   : > { %1144 = vmatpush3.msra.mxu0 %v666_v26  ;;  %1234 = vmatpush3.msra.mxu1 %v666_v26 }
 0x1e8   : > { %1145 = vmatprep.subr.mxu0 %v665_v33  ;;  %1219 = vmatprep.subr.mxu1 %v665_v33 }
 0x1e9   : > { %1146 = vmatpush3.msra.mxu0 %v665_v33  ;;  %1235 = vmatpush3.msra.mxu1 %v665_v33 }
 0x1ea   : > { %1147 = vmatprep.subr.mxu0 %v664_v41  ;;  %1220 = vmatprep.subr.mxu1 %v664_v41 }
 0x1eb   : > { %1148 = vmatpush3.msra.mxu0 %v664_v41  ;;  %1236 = vmatpush3.msra.mxu1 %v664_v41 }
 0x1ec   : > { %1149 = vmatprep.mubr.f32.mxu0 %v648_v42  ;;  %1161 = vmatprep.mubr.f32.mxu1 %v656_v43 }
 0x1ed   : > { %1150 = vmatmul.mubr.f32.vlgmr.msra.gmra.mxu0 %v649_v46  ;;  %1162 = vmatmul.mubr.f32.vlgmr.msra.gmra.mxu1 %v657_v47 }
 0x1ee   : > { %1152 = vmatprep.mubr.f32.mxu0 %v650_v50  ;;  %1164 = vmatprep.mubr.f32.mxu1 %v658_v54 }
 0x1f1   : > { %1153 = vmatmul.mubr.f32.gmra.mxu0 %v651_v60  ;;  %1165 = vmatmul.mubr.f32.gmra.mxu1 %v659_v62 }
 0x1f2   : > { %1155 = vmatprep.mubr.f32.mxu0 %v652_v2  ;;  %1167 = vmatprep.mubr.f32.mxu1 %v660_v3 }
 0x1f5   : > { %1156 = vmatmul.mubr.f32.gmra.mxu0 %v653_v6  ;;  %1168 = vmatmul.mubr.f32.gmra.mxu1 %v661_v8 }
 0x1f6   : > { %1158 = vmatprep.mubr.f32.mxu0 %v654_v11  ;;  %1170 = vmatprep.mubr.f32.mxu1 %v662_v7 }
 0x1f9   : > { %1159 = vmatmul.mubr.f32.gmra.mxu0 %v655_v12  ;;  %1171 = vmatmul.mubr.f32.gmra.mxu1 %v663_v13 }
 0x2ad   : > { %v1151_v15 = vpop.f32.mrf.mxu0  ;;  %v1163_v16 = vpop.f32.mrf.mxu1 }
 0x2ae   : > { %v759_v17 = vadd.f32 %v1151_v15, %v989_v14  ;;  %v799_v18 = vadd.f32 %v1163_v16, %v989_v14 }
 0x2af   : > { %v753_v19 = vpop.f32.mrf.mxu0  ;;  %v793_v20 = vpop.f32.mrf.mxu1 }
 0x2b0   : > { %833 = vst [vmem:[%s1801_s8 + $0x8] sm:$0xff] %v759_v17  ;;  %841 = vst [vmem:[%s1801_s8 + $0x48] sm:$0xff] %v799_v18  ;;  %v754_v21 = vadd.f32 %v989_v14, %v753_v19  ;;  %v794_v22 = vadd.f32 %v989_v14, %v793_v20 }
 0x2b1   : > { %v1154_v23 = vpop.f32.mrf.mxu0  ;;  %v1166_v24 = vpop.f32.mrf.mxu1 }
 0x2b2   : > { %832 = vst [vmem:[%s1801_s8] sm:$0xff] %v754_v21  ;;  %840 = vst [vmem:[%s1801_s8 + $0x40] sm:$0xff] %v794_v22  ;;  %v769_v25 = vadd.f32 %v1154_v23, %v989_v14  ;;  %v809_v26 = vadd.f32 %v1166_v24, %v989_v14 }
 0x2b3   : > { %v763_v27 = vpop.f32.mrf.mxu0  ;;  %v803_v28 = vpop.f32.mrf.mxu1 }
 0x2b4   : > { %835 = vst [vmem:[%s1801_s8 + $0x18] sm:$0xff] %v769_v25  ;;  %843 = vst [vmem:[%s1801_s8 + $0x58] sm:$0xff] %v809_v26  ;;  %v764_v29 = vadd.f32 %v989_v14, %v763_v27  ;;  %v804_v30 = vadd.f32 %v989_v14, %v803_v28 }
 0x2b5   : > { %v1157_v31 = vpop.f32.mrf.mxu0  ;;  %v1169_v32 = vpop.f32.mrf.mxu1 }
 0x2b6   : > { %834 = vst [vmem:[%s1801_s8 + $0x10] sm:$0xff] %v764_v29  ;;  %842 = vst [vmem:[%s1801_s8 + $0x50] sm:$0xff] %v804_v30  ;;  %v779_v33 = vadd.f32 %v1157_v31, %v989_v14  ;;  %v819_v34 = vadd.f32 %v1169_v32, %v989_v14 }
 0x2b7   : > { %v773_v35 = vpop.f32.mrf.mxu0  ;;  %v813_v36 = vpop.f32.mrf.mxu1 }
 0x2b8   : > { %837 = vst [vmem:[%s1801_s8 + $0x28] sm:$0xff] %v779_v33  ;;  %845 = vst [vmem:[%s1801_s8 + $0x68] sm:$0xff] %v819_v34  ;;  %v774_v37 = vadd.f32 %v989_v14, %v773_v35  ;;  %v814_v38 = vadd.f32 %v989_v14, %v813_v36 }
 0x2b9   : > { %v1160_v39 = vpop.f32.mrf.mxu0  ;;  %v1172_v40 = vpop.f32.mrf.mxu1 }
 0x2ba   : > { %836 = vst [vmem:[%s1801_s8 + $0x20] sm:$0xff] %v774_v37  ;;  %844 = vst [vmem:[%s1801_s8 + $0x60] sm:$0xff] %v814_v38  ;;  %v789_v41 = vadd.f32 %v1160_v39, %v989_v14  ;;  %v829_v42 = vadd.f32 %v1172_v40, %v989_v14 }
 0x2bb   : > { %v783_v43 = vpop.f32.mrf.mxu0  ;;  %v823_v44 = vpop.f32.mrf.mxu1 }
 0x2bc   : > { %839 = vst [vmem:[%s1801_s8 + $0x38] sm:$0xff] %v789_v41  ;;  %847 = vst [vmem:[%s1801_s8 + $0x78] sm:$0xff] %v829_v42  ;;  %v784_v45 = vadd.f32 %v989_v14, %v783_v43  ;;  %v824_v46 = vadd.f32 %v989_v14, %v823_v44 }
 0x2be   : > { %838 = vst [vmem:[%s1801_s8 + $0x30] sm:$0xff] %v784_v45  ;;  %846 = vst [vmem:[%s1801_s8 + $0x70] sm:$0xff] %v824_v46 }
 0x2bf PF: > { %s2050_s24 = sld [smem:[#allocation17_spill]]  ;;  %s863_s17 = sshll.u32 %s1801_s8, 4  ;;  %s1928_s17 = int_to_ptr.vmem [resolvable:$true] %s863_s17 }
 0x2c0   : > { %s2051_s15 = sld [smem:[#allocation16_spill]]  ;;  %s1937_s27 = scalar_lea.sflag [#allocation7], %s289_s11 }
 0x2c1   : > { %s2052_s16 = sld [smem:[#allocation20_spill]]  ;;  %s1447_s25 = scalar_lea.vmem %s1928_s17, 2048 }
 0x2c2   : > { %s2053_s3 = sld [smem:[#allocation26_spill]]  ;;  %p1448_p12 = scmp.ne.s32.totalorder %s1928_s17, %s1447_s25 }
 0x2c3   : > { %s1579_s8 = smov [#allocation11]  }
 0x2c4   : > { %s1451_s9 = sshll.u32 %s1579_s8, 4  ;;  %s1452_s9 = int_to_ptr.vmem [resolvable:$false] %s1451_s9 }
 0x2c5   : > { %s1453_s10 = scalar_lea.vmem %s1452_s9, 4096  ;;  %p1454_p6 = scmp.lt.s32.totalorder %s1928_s17, %s1452_s9 }
 0x2c6   : > { %s856_s6 = smul.u32 %s2051_s15, %s2050_s24  ;;  %p1455_p8 = scmp.lt.s32.totalorder %s1453_s10, %s1447_s25 }
 0x2c7   : > { %p2054_p0 = scmp.ne.s32.totalorder %s2052_s16, 0 }
 0x2c8   : > { %s996_s30 = sshll.u32 %s856_s6, 11  ;;  %p1456_p10 = por %p1455_p8, %p1454_p6 }
 0x2c9   : > { %s1933_s18 = scalar_lea.hbm %s2053_s3, %s996_s30  ;;  %p1449_p2 = pnand %p1448_p12, %p2054_p0 }
 0x2cb   : > { %p1450_p4 = pneg %p1449_p2 }
 0x2cd   : > { %p1457_p7 = pnand %p1456_p10, %p1450_p4 }
 0x2cf   : > { %1460 = shalt.err (!%p1457_p7)
}
 0x2d0   : > { %s1461_s11 = scalar_lea.hbm %s1933_s18, 2048  ;;  %s1465_s7 = scalar_lea.hbm %s2053_s3, 6144 }
 0x2d1   : > { %p1462_p9 = scmp.ne.s32.totalorder %s1933_s18, %s1461_s11  ;;  %p1466_p11 = scmp.lt.s32.totalorder %s1933_s18, %s2053_s3 }
 0x2d2   : > { %p1467_p13 = scmp.lt.s32.totalorder %s1465_s7, %s1461_s11 }
 0x2d3   : > { %p1463_p3 = pnand %p1462_p9, %p2054_p0 }
 0x2d4   : > { %p1468_p5 = por %p1467_p13, %p1466_p11 }
 0x2d5   : > { %p1464_p1 = pneg %p1463_p3 }
 0x2d7   : > { %p1469_p12 = pnand %p1468_p5, %p1464_p1 }
 0x2d9   : > { %1472 = shalt.err (!%p1469_p12)
}
 0x2da   : > { %s1580_s15 = smov 128   ;;  %s1581_s6 = smov 8  }
 0x2db   : > { %1247 = dma.vmem_to_hbm [thread:$0]  (%p2054_p0), %s1928_s17, 2048, %s1933_s18, %s1937_s27, %s1580_s15, %s1580_s15, %s1581_s6  }
 0x2dc PF: > { %s2055_s30 = sld [smem:[#allocation15_spill]]  ;;  %p1269_p2 = scmp.ge.s32.totalorder %s1571_s28, 2 }
 0x2dd   : > { %s2056_s21 = sld [smem:[#allocation21_spill]] }
 0x2e2   : > { %s878_s1 = sand.u32 1, %s2055_s30  }
 0x2e3   : > { %p2057_p4 = scmp.ne.s32.totalorder %s2056_s21, 0  ;;  %s879_s25 = scalar_lea.sflag [#allocation7], %s878_s1 }
 0x2e5   : > { %p1261_p6 = pnand %p1269_p2, %p2057_p4 }
 0x2e7   : > { %p1262_p8 = pneg %p1261_p6 }
 0x2e9   : > { %1526 = dma.done.wait (%p1262_p8), %s879_s25, 2048  }
 0x2ea   : > { %1528 = vsyncadd (%p1262_p8), %s879_s25, 4294965248  ;;  %s22_s28 = sadd.s32 1, %s1571_s28   ;;  %s2058_s24 = sld [smem:[#allocation18_spill]] }
 0x2eb   : > { %p19_p10 = scmp.ge.s32.totalorder %s22_s28, 8   ;;  %s2059_s25 = sld [smem:[#allocation19_spill]] }
 0x2ec   : > { %s2060_s18 = smov %s1535_s19  ;;  %s2061_s19 = smov %s1539_s20 }
 0x2ed   : > { %s2062_s20 = smov %s1757_s26  ;;  %s2063_s21 = smov %s1547_s22 }
 0x2ee   : > { %s2064_s22 = smov %s1551_s23  ;;  %s2065_s23 = smov %s1760_s5 }
 0x2ef   : > { %s2066_s26 = smov %s2069_s13  ;;  %s2067_s27 = smov %s2073_s14 }
 0x2f0   :  { %21 = sbr.rel (!%p19_p10) target bundleno = 16 (0x10), region = 111 }
 0x2f5   :  { %884 = vsyncpa [#allocation6], 1 }
 0x2f6   :  { %886 = vsyncpa [#allocation6 + $0x1], 1 }
 0x2f7   :  { %887 = vsyncpa [#allocation9], 1 }
 0x2f8   :  { %888 = vsyncpa [#allocation7], 1 }
 0x2f9   :  { %890 = vsyncpa [#allocation7 + $0x1], 1 }

</bundles_post_ra>
